<compile_context>
chip_gen: v7x
topology: tpu7x:2x2x1
jax: 0.10.0
libtpu: 0.0.40
codegen_flags: <defaults>
</compile_context>

<pallas_src>
import functools
import math

import jax
import jax.numpy as jnp
from jax import lax
from jax.experimental import pallas as pl
from jax.experimental.pallas import tpu as pltpu

MATMUL_DTYPE = jnp.bfloat16   # MXU operand dtype (f32 accumulate); bf16 MXU on v5e/v6e/v7x
TIME_CHUNK = 32               # timesteps per LSTM grid step
ROW_TILE_CAP = 512            # max rows per tile for the parallel GEMM stages


def _round_up(x, m):
    return (x + m - 1) // m * m


def _row_tile(n, cap=ROW_TILE_CAP):
    """Largest multiple-of-8 divisor of n that is <= cap (n is a multiple of 8)."""
    best = 8
    for c in range(8, min(n, cap) + 1, 8):
        if n % c == 0:
            best = c
    return best


# ----------------------------------------------------------------------------
# Hoisted gate projection: gx[d] = x @ Wih[d] + (b_ih + b_hh)[d], both
# directions in one row-tiled GEMM kernel, output stacked (2, N, 4H).
# ----------------------------------------------------------------------------
def _gate_proj_first_kernel(x_ref, wf_ref, wb_ref, bf_ref, bb_ref, o_ref):
    x = x_ref[...].astype(MATMUL_DTYPE)
    o_ref[0] = jnp.dot(x, wf_ref[...], preferred_element_type=jnp.float32) + bf_ref[...]
    o_ref[1] = jnp.dot(x, wb_ref[...], preferred_element_type=jnp.float32) + bb_ref[...]


def gate_proj_first(x2d, wf, wb, bf, bb):
    N, In = x2d.shape
    G = wf.shape[1]
    tn = _row_tile(N)
    return pl.pallas_call(
        _gate_proj_first_kernel,
        grid=(N // tn,),
        in_specs=[pl.BlockSpec((tn, In), lambda i: (i, 0)),
                  pl.BlockSpec((In, G), lambda i: (0, 0)),
                  pl.BlockSpec((In, G), lambda i: (0, 0)),
                  pl.BlockSpec((1, G), lambda i: (0, 0)),
                  pl.BlockSpec((1, G), lambda i: (0, 0))],
        out_specs=pl.BlockSpec((2, tn, G), lambda i: (0, i, 0)),
        out_shape=jax.ShapeDtypeStruct((2, N, G), jnp.float32),
        compiler_params=pltpu.CompilerParams(dimension_semantics=("parallel",)),
    )(x2d, wf, wb, bf, bb)


def _gate_proj_mid_kernel(y_ref, wff_ref, wfb_ref, wbf_ref, wbb_ref,
                          bf_ref, bb_ref, o_ref):
    # y_ref holds the previous layer's (fwd, bwd) outputs stacked on axis 0;
    # the concat([y_f, y_b]) @ Wih is done as two half-matmuls (no concat).
    yf = y_ref[0].astype(MATMUL_DTYPE)
    yb = y_ref[1].astype(MATMUL_DTYPE)
    o_ref[0] = (jnp.dot(yf, wff_ref[...], preferred_element_type=jnp.float32)
                + jnp.dot(yb, wfb_ref[...], preferred_element_type=jnp.float32)
                + bf_ref[...])
    o_ref[1] = (jnp.dot(yf, wbf_ref[...], preferred_element_type=jnp.float32)
                + jnp.dot(yb, wbb_ref[...], preferred_element_type=jnp.float32)
                + bb_ref[...])


def gate_proj_mid(y3, wff, wfb, wbf, wbb, bf, bb):
    _, N, H = y3.shape
    G = wff.shape[1]
    tn = _row_tile(N)
    return pl.pallas_call(
        _gate_proj_mid_kernel,
        grid=(N // tn,),
        in_specs=[pl.BlockSpec((2, tn, H), lambda i: (0, i, 0))]
                 + [pl.BlockSpec((H, G), lambda i: (0, 0))] * 4
                 + [pl.BlockSpec((1, G), lambda i: (0, 0))] * 2,
        out_specs=pl.BlockSpec((2, tn, G), lambda i: (0, i, 0)),
        out_shape=jax.ShapeDtypeStruct((2, N, G), jnp.float32),
        compiler_params=pltpu.CompilerParams(dimension_semantics=("parallel",)),
    )(y3, wff, wfb, wbf, wbb, bf, bb)


# ----------------------------------------------------------------------------
# Bidirectional LSTM recurrence: grid = (2 directions, n_chunks), state in
# VMEM scratch, CHUNK timesteps per grid step (unrolled fori_loop).
# ----------------------------------------------------------------------------
def _bilstm_kernel(len_ref, gx_ref, whh_ref, y_ref, c_ref, h_sc, c_sc, *,
                   chunk, hidden):
    d = pl.program_id(0)            # 0 = forward, 1 = backward
    ci = pl.program_id(1)           # chunk index (grid order)
    nc = pl.num_programs(1)

    @pl.when(ci == 0)
    def _():
        h_sc[...] = jnp.zeros_like(h_sc)
        c_sc[...] = jnp.zeros_like(c_sc)

    lengths = len_ref[...]          # (B_pad, 1) int32
    whh = whh_ref[...]              # (H, 4H) matmul dtype
    H = hidden
    src_chunk = d * (nc - 1) + (1 - 2 * d) * ci   # reversed chunk order for bwd
    base_t = src_chunk * chunk

    def step(i, carry):
        h_prev, c_prev = carry
        t_loc = d * (chunk - 1) + (1 - 2 * d) * i          # reversed within chunk for bwd
        g = gx_ref[t_loc] + jnp.dot(h_prev.astype(whh.dtype), whh,
                                    preferred_element_type=jnp.float32)
        i_g = jax.nn.sigmoid(g[:, :H])
        f_g = jax.nn.sigmoid(g[:, H:2 * H])
        g_g = jnp.tanh(g[:, 2 * H:3 * H])
        o_g = jax.nn.sigmoid(g[:, 3 * H:])
        c_new = f_g * c_prev + i_g * g_g
        h_new = o_g * jnp.tanh(c_new)
        # packed-sequence masking: steps >= length are frozen and emit zeros.
        valid = (base_t + t_loc) < lengths                 # (B_pad, 1)
        y_ref[t_loc] = jnp.where(valid, h_new, jnp.zeros_like(h_new))
        return (jnp.where(valid, h_new, h_prev),
                jnp.where(valid, c_new, c_prev))

    h_fin, c_fin = lax.fori_loop(0, chunk, step, (h_sc[...], c_sc[...]),
                                 unroll=True)
    h_sc[...] = h_fin
    c_sc[...] = c_fin
    # Written every chunk (cheap VMEM store); HBM writeback only happens on
    # direction switch / grid end, so the final cell is what lands in HBM.
    c_ref[...] = c_fin


def bilstm_layer(gx, whh, lengths_col, *, chunk):
    """gx: (2, S_pad, B_pad, 4H) f32; whh: (2, H, 4H); lengths_col: (B_pad, 1) i32."""
    _, S_pad, B_pad, G = gx.shape
    H = G // 4
    nc = S_pad // chunk
    kernel = functools.partial(_bilstm_kernel, chunk=chunk, hidden=H)

    def t_idx(d, c):                 # backward direction walks chunks in reverse
        return d * (nc - 1) + (1 - 2 * d) * c

    y, c_last = pl.pallas_call(
        kernel,
        grid=(2, nc),
        in_specs=[pl.BlockSpec((B_pad, 1), lambda d, c: (0, 0)),
                  pl.BlockSpec((None, chunk, B_pad, G),
                               lambda d, c: (d, t_idx(d, c), 0, 0)),
                  pl.BlockSpec((None, H, G), lambda d, c: (d, 0, 0))],
        out_specs=(pl.BlockSpec((None, chunk, B_pad, H),
                                lambda d, c: (d, t_idx(d, c), 0, 0)),
                   pl.BlockSpec((None, B_pad, H), lambda d, c: (d, 0, 0))),
        out_shape=(jax.ShapeDtypeStruct((2, S_pad, B_pad, H), jnp.float32),
                   jax.ShapeDtypeStruct((2, B_pad, H), jnp.float32)),
        scratch_shapes=[pltpu.VMEM((B_pad, H), jnp.float32),
                        pltpu.VMEM((B_pad, H), jnp.float32)],
        compiler_params=pltpu.CompilerParams(
            dimension_semantics=("parallel", "arbitrary")),
    )(lengths_col, gx, whh)
    return y, c_last


# ----------------------------------------------------------------------------
# Fused mean(fwd, bwd) + linear_key + linear_values (row-tiled).
# ----------------------------------------------------------------------------
def _kv_kernel(y_ref, wk_ref, wv_ref, bk_ref, bv_ref, k_ref, v_ref):
    m = (0.5 * (y_ref[0] + y_ref[1])).astype(MATMUL_DTYPE)
    k_ref[...] = jnp.dot(m, wk_ref[...], preferred_element_type=jnp.float32) + bk_ref[...]
    v_ref[...] = jnp.dot(m, wv_ref[...], preferred_element_type=jnp.float32) + bv_ref[...]


def keys_values(y3, wk, wv, bk, bv):
    _, N, H = y3.shape
    Ho = wk.shape[1]
    tn = _row_tile(N)
    return pl.pallas_call(
        _kv_kernel,
        grid=(N // tn,),
        in_specs=[pl.BlockSpec((2, tn, H), lambda i: (0, i, 0)),
                  pl.BlockSpec((H, Ho), lambda i: (0, 0)),
                  pl.BlockSpec((H, Ho), lambda i: (0, 0)),
                  pl.BlockSpec((1, Ho), lambda i: (0, 0)),
                  pl.BlockSpec((1, Ho), lambda i: (0, 0))],
        out_specs=(pl.BlockSpec((tn, Ho), lambda i: (i, 0)),
                   pl.BlockSpec((tn, Ho), lambda i: (i, 0))),
        out_shape=(jax.ShapeDtypeStruct((N, Ho), jnp.float32),
                   jax.ShapeDtypeStruct((N, Ho), jnp.float32)),
        compiler_params=pltpu.CompilerParams(dimension_semantics=("parallel",)),
    )(y3, wk, wv, bk, bv)


# ----------------------------------------------------------------------------
# decoder_init for ALL layers in one batched matmul (+ tanh).
# ----------------------------------------------------------------------------
def _dec_init_kernel(cf_ref, cb_ref, wf_ref, wb_ref, b_ref, cell_ref, state_ref):
    cell = (jnp.dot(cf_ref[...].astype(MATMUL_DTYPE), wf_ref[...],
                    preferred_element_type=jnp.float32)
            + jnp.dot(cb_ref[...].astype(MATMUL_DTYPE), wb_ref[...],
                      preferred_element_type=jnp.float32)
            + b_ref[...])
    cell_ref[...] = cell
    state_ref[...] = jnp.tanh(cell)


def decoder_init(cf, cb, wf, wb, b):
    # cf/cb: (L*B_pad, H) — always tiny, single block is the right choice here.
    N, H = cf.shape
    Ho = wf.shape[1]
    return pl.pallas_call(
        _dec_init_kernel,
        grid=(1,),
        in_specs=[pl.BlockSpec((N, H), lambda i: (0, 0)),
                  pl.BlockSpec((N, H), lambda i: (0, 0)),
                  pl.BlockSpec((H, Ho), lambda i: (0, 0)),
                  pl.BlockSpec((H, Ho), lambda i: (0, 0)),
                  pl.BlockSpec((1, Ho), lambda i: (0, 0))],
        out_specs=(pl.BlockSpec((N, Ho), lambda i: (0, 0)),
                   pl.BlockSpec((N, Ho), lambda i: (0, 0))),
        out_shape=(jax.ShapeDtypeStruct((N, Ho), jnp.float32),
                   jax.ShapeDtypeStruct((N, Ho), jnp.float32)),
    )(cf, cb, wf, wb, b)


# ----------------------------------------------------------------------------
# Full Encoder.forward
# ----------------------------------------------------------------------------
def encoder_forward(params, tokens, lengths):
    B, S = tokens.shape
    H = params["key_w"].shape[1]
    L = len(params["lstm"])
    mdt = MATMUL_DTYPE

    chunk = min(TIME_CHUNK, S)
    S_pad = _round_up(S, chunk)
    B_pad = _round_up(B, 8)
    N = S_pad * B_pad

    # pad ids/lengths (padded rows have length 0 -> frozen zero state).
    tok_p = jnp.zeros((B_pad, S_pad), jnp.int32).at[:B, :S].set(tokens)
    len_col = jnp.zeros((B_pad,), jnp.int32).at[:B].set(
        lengths.astype(jnp.int32)).reshape(B_pad, 1)

    # Embedding gather directly in time-major layout (no big activation transpose).
    emb = jnp.take(params["embed"], tok_p.T, axis=0).astype(jnp.float32)  # (S_pad,B_pad,E)
    x2d = emb.reshape(N, -1)

    c_lasts = []
    y3 = None
    for li, layer in enumerate(params["lstm"]):
        whh = layer["whh"].astype(mdt)
        if li == 0:
            g = gate_proj_first(x2d,
                                layer["wih_f"][0].astype(mdt),
                                layer["wih_b"][0].astype(mdt),
                                layer["b_f"], layer["b_b"])
        else:
            g = gate_proj_mid(y3,
                              layer["wih_f"][0].astype(mdt), layer["wih_f"][1].astype(mdt),
                              layer["wih_b"][0].astype(mdt), layer["wih_b"][1].astype(mdt),
                              layer["b_f"], layer["b_b"])
        gx = g.reshape(2, S_pad, B_pad, 4 * H)
        y4, c_last = bilstm_layer(gx, whh, len_col, chunk=chunk)
        c_lasts.append(c_last)
        y3 = y4.reshape(2, N, H)          # free bitcast; feeds next layer / keys-values

    # keys / values (mean of directions fused in-kernel).
    keys2d, vals2d = keys_values(y3, params["key_w"].astype(mdt),
                                 params["val_w"].astype(mdt),
                                 params["key_b"], params["val_b"])
    keys = keys2d.reshape(S_pad, B_pad, H)[:S, :B].transpose(1, 0, 2)     # (B,S,H)
    values = vals2d.reshape(S_pad, B_pad, H)[:S, :B].transpose(1, 0, 2)

    # decoder_init, all layers batched into one matmul.
    cf_all = jnp.concatenate([c[0] for c in c_lasts], axis=0)             # (L*B_pad, H)
    cb_all = jnp.concatenate([c[1] for c in c_lasts], axis=0)
    cells2d, states2d = decoder_init(cf_all, cb_all,
                                     params["dec_wf"].astype(mdt),
                                     params["dec_wb"].astype(mdt),
                                     params["dec_b"])
    cells = cells2d.reshape(L, B_pad, H)[:, :B]
    states = states2d.reshape(L, B_pad, H)[:, :B]
    dec_init_cells = [cells[j] for j in range(L)]
    dec_init_states = [states[j] for j in range(L)]
    return keys, values, (dec_init_states, dec_init_cells)


# ----------------------------------------------------------------------------
# Deterministic parameter init (shapes per Encoder.__init__, pte=None).
# Weights stored pre-transposed (In, Out); gate order i, f, g, o.
# ----------------------------------------------------------------------------
def init_params(key, vocab, E, H, L):
    ks = iter(jax.random.split(key, 8 + 12 * L))
    p = {}
    xb = math.sqrt(6.0 / (vocab + E))                      # xavier_uniform
    p["embed"] = jax.random.uniform(next(ks), (vocab, E), jnp.float32, -xb, xb)

    s = 1.0 / math.sqrt(H)
    lstm = []
    for layer_i in range(L):
        layer = {}
        whhs = []
        for dname in ("f", "b"):
            if layer_i == 0:
                wih = (jax.random.uniform(next(ks), (E, 4 * H), jnp.float32, -s, s),)
            else:                                          # split halves of (2H, 4H)
                wih = (jax.random.uniform(next(ks), (H, 4 * H), jnp.float32, -s, s),
                       jax.random.uniform(next(ks), (H, 4 * H), jnp.float32, -s, s))
            whhs.append(jax.random.uniform(next(ks), (H, 4 * H), jnp.float32, -s, s))
            # combined bias = b_ih + b_hh (two independent draws, like PyTorch)
            bias = (jax.random.uniform(next(ks), (1, 4 * H), jnp.float32, -s, s)
                    + jax.random.uniform(next(ks), (1, 4 * H), jnp.float32, -s, s))
            layer["wih_" + dname] = wih
            layer["b_" + dname] = bias
        layer["whh"] = jnp.stack(whhs, axis=0)             # (2, H, 4H)
        lstm.append(layer)
    p["lstm"] = lstm

    lb = 1.0 / math.sqrt(H)
    p["key_w"] = jax.random.uniform(next(ks), (H, H), jnp.float32, -lb, lb)
    p["key_b"] = jax.random.uniform(next(ks), (1, H), jnp.float32, -lb, lb)
    p["val_w"] = jax.random.uniform(next(ks), (H, H), jnp.float32, -lb, lb)
    p["val_b"] = jax.random.uniform(next(ks), (1, H), jnp.float32, -lb, lb)

    db = 1.0 / math.sqrt(2 * H)
    p["dec_wf"] = jax.random.uniform(next(ks), (H, H), jnp.float32, -db, db)
    p["dec_wb"] = jax.random.uniform(next(ks), (H, H), jnp.float32, -db, db)
    p["dec_b"] = jax.random.uniform(next(ks), (1, H), jnp.float32, -db, db)
    return p


if __name__ == "__main__":
    B, S, E, H, L, V = 4, 8, 32, 32, 2, 50
    root = jax.random.PRNGKey(0)
    k_params, k_tok = jax.random.split(root)

    params = init_params(k_params, V, E, H, L)
    tokens = jax.random.randint(k_tok, (B, S), 0, V, dtype=jnp.int32)
    # pack_padded_sequence expects descending lengths; max length == S
    input_len = jnp.array([8, 6, 5, 3], dtype=jnp.int32)

    fwd = jax.jit(encoder_forward)
    keys_out, values_out, (dec_states, dec_cells) = fwd(params, tokens, input_len)
    jax.block_until_ready((keys_out, values_out, dec_states, dec_cells))

    assert keys_out.shape == (B, S, H)
    assert values_out.shape == (B, S, H)
    assert len(dec_states) == L and dec_states[0].shape == (B, H)
    assert all(bool(jnp.isfinite(a).all()) for a in
               [keys_out, values_out] + list(dec_states) + list(dec_cells))
    print("KERNEL_OK")
</pallas_src>

<mosaic_0001>
module attributes {stable_mosaic.version = 11 : i64} {
  func.func @_gate_proj_mid_kernel(%arg0: i32, %arg1: memref<2x64x32xf32, #tpu.memory_space<vmem>>, %arg2: memref<32x128xbf16, #tpu.memory_space<vmem>>, %arg3: memref<32x128xbf16, #tpu.memory_space<vmem>>, %arg4: memref<32x128xbf16, #tpu.memory_space<vmem>>, %arg5: memref<32x128xbf16, #tpu.memory_space<vmem>>, %arg6: memref<1x128xf32, #tpu.memory_space<vmem>>, %arg7: memref<1x128xf32, #tpu.memory_space<vmem>>, %arg8: memref<2x64x128xf32, #tpu.memory_space<vmem>>) attributes {dimension_semantics = [#tpu.dimension_semantics<parallel>], iteration_bounds = array<i64: 1>, scalar_prefetch = 0 : i64, scratch_operands = 0 : i64, tpu.core_type = #tpu.core_type<tc>, window_params = [{transform_indices = @transform_0, window_bounds = array<i64: 2, 64, 32>}, {pipeline_mode = #tpu.pipeline_mode<synchronous>, transform_indices = @transform_1, window_bounds = array<i64: 32, 128>}, {pipeline_mode = #tpu.pipeline_mode<synchronous>, transform_indices = @transform_2, window_bounds = array<i64: 32, 128>}, {pipeline_mode = #tpu.pipeline_mode<synchronous>, transform_indices = @transform_3, window_bounds = array<i64: 32, 128>}, {pipeline_mode = #tpu.pipeline_mode<synchronous>, transform_indices = @transform_4, window_bounds = array<i64: 32, 128>}, {pipeline_mode = #tpu.pipeline_mode<synchronous>, transform_indices = @transform_5, window_bounds = array<i64: 1, 128>}, {pipeline_mode = #tpu.pipeline_mode<synchronous>, transform_indices = @transform_6, window_bounds = array<i64: 1, 128>}, {transform_indices = @transform_7, window_bounds = array<i64: 2, 64, 128>}]} {
    %c0 = arith.constant 0 : index
    %c0_0 = arith.constant 0 : index
    %c0_1 = arith.constant 0 : index
    %0 = vector.load %arg1[%c0, %c0_0, %c0_1] : memref<2x64x32xf32, #tpu.memory_space<vmem>>, vector<1x64x32xf32>
    %1 = vector.shape_cast %0 : vector<1x64x32xf32> to vector<64x32xf32>
    %2 = arith.truncf %1 : vector<64x32xf32> to vector<64x32xbf16>
    %c1 = arith.constant 1 : index
    %c0_2 = arith.constant 0 : index
    %c0_3 = arith.constant 0 : index
    %3 = vector.load %arg1[%c1, %c0_2, %c0_3] : memref<2x64x32xf32, #tpu.memory_space<vmem>>, vector<1x64x32xf32>
    %4 = vector.shape_cast %3 : vector<1x64x32xf32> to vector<64x32xf32>
    %5 = arith.truncf %4 : vector<64x32xf32> to vector<64x32xbf16>
    %c0_4 = arith.constant 0 : index
    %c0_5 = arith.constant 0 : index
    %6 = vector.load %arg2[%c0_4, %c0_5] : memref<32x128xbf16, #tpu.memory_space<vmem>>, vector<32x128xbf16>
    %cst = arith.constant dense<0.000000e+00> : vector<64x128xf32>
    %7 = tpu.matmul %2, %6, %cst {dimension_numbers = #tpu.dot_dimension_numbers<[1], [0], [0], [1], [0, 0, 1, 1], [], []>} : vector<64x32xbf16>, vector<32x128xbf16>, vector<64x128xf32> -> vector<64x128xf32>
    %c0_6 = arith.constant 0 : index
    %c0_7 = arith.constant 0 : index
    %8 = vector.load %arg3[%c0_6, %c0_7] : memref<32x128xbf16, #tpu.memory_space<vmem>>, vector<32x128xbf16>
    %cst_8 = arith.constant dense<0.000000e+00> : vector<64x128xf32>
    %9 = tpu.matmul %5, %8, %cst_8 {dimension_numbers = #tpu.dot_dimension_numbers<[1], [0], [0], [1], [0, 0, 1, 1], [], []>} : vector<64x32xbf16>, vector<32x128xbf16>, vector<64x128xf32> -> vector<64x128xf32>
    %10 = arith.addf %7, %9 : vector<64x128xf32>
    %c0_9 = arith.constant 0 : index
    %c0_10 = arith.constant 0 : index
    %11 = vector.load %arg6[%c0_9, %c0_10] : memref<1x128xf32, #tpu.memory_space<vmem>>, vector<1x128xf32>
    %12 = vector.broadcast %11 : vector<1x128xf32> to vector<64x128xf32>
    %13 = arith.addf %10, %12 : vector<64x128xf32>
    %c0_11 = arith.constant 0 : index
    %c0_12 = arith.constant 0 : index
    %c0_13 = arith.constant 0 : index
    %14 = vector.load %arg8[%c0_11, %c0_12, %c0_13] : memref<2x64x128xf32, #tpu.memory_space<vmem>>, vector<1x64x128xf32>
    %15 = vector.shape_cast %14 : vector<1x64x128xf32> to vector<64x128xf32>
    %16 = vector.shape_cast %13 : vector<64x128xf32> to vector<1x64x128xf32>
    tpu.vector_store %arg8[%c0_11, %c0_12, %c0_13], %16 {strides = array<i32>} : memref<2x64x128xf32, #tpu.memory_space<vmem>>, vector<1x64x128xf32>,
    %c0_14 = arith.constant 0 : index
    %c0_15 = arith.constant 0 : index
    %17 = vector.load %arg4[%c0_14, %c0_15] : memref<32x128xbf16, #tpu.memory_space<vmem>>, vector<32x128xbf16>
    %cst_16 = arith.constant dense<0.000000e+00> : vector<64x128xf32>
    %18 = tpu.matmul %2, %17, %cst_16 {dimension_numbers = #tpu.dot_dimension_numbers<[1], [0], [0], [1], [0, 0, 1, 1], [], []>} : vector<64x32xbf16>, vector<32x128xbf16>, vector<64x128xf32> -> vector<64x128xf32>
    %c0_17 = arith.constant 0 : index
    %c0_18 = arith.constant 0 : index
    %19 = vector.load %arg5[%c0_17, %c0_18] : memref<32x128xbf16, #tpu.memory_space<vmem>>, vector<32x128xbf16>
    %cst_19 = arith.constant dense<0.000000e+00> : vector<64x128xf32>
    %20 = tpu.matmul %5, %19, %cst_19 {dimension_numbers = #tpu.dot_dimension_numbers<[1], [0], [0], [1], [0, 0, 1, 1], [], []>} : vector<64x32xbf16>, vector<32x128xbf16>, vector<64x128xf32> -> vector<64x128xf32>
    %21 = arith.addf %18, %20 : vector<64x128xf32>
    %c0_20 = arith.constant 0 : index
    %c0_21 = arith.constant 0 : index
    %22 = vector.load %arg7[%c0_20, %c0_21] : memref<1x128xf32, #tpu.memory_space<vmem>>, vector<1x128xf32>
    %23 = vector.broadcast %22 : vector<1x128xf32> to vector<64x128xf32>
    %24 = arith.addf %21, %23 : vector<64x128xf32>
    %c1_22 = arith.constant 1 : index
    %c0_23 = arith.constant 0 : index
    %c0_24 = arith.constant 0 : index
    %25 = vector.load %arg8[%c1_22, %c0_23, %c0_24] : memref<2x64x128xf32, #tpu.memory_space<vmem>>, vector<1x64x128xf32>
    %26 = vector.shape_cast %25 : vector<1x64x128xf32> to vector<64x128xf32>
    %27 = vector.shape_cast %24 : vector<64x128xf32> to vector<1x64x128xf32>
    tpu.vector_store %arg8[%c1_22, %c0_23, %c0_24], %27 {strides = array<i32>} : memref<2x64x128xf32, #tpu.memory_space<vmem>>, vector<1x64x128xf32>,
    return
  }
  func.func @transform_0(%arg0: i32) -> (i32, i32, i32) {
    %c0_i32 = arith.constant 0 : i32
    %c0_i32_0 = arith.constant 0 : i32
    %c0_i32_1 = arith.constant 0 : i32
    return %c0_i32, %arg0, %c0_i32_0 : i32, i32, i32
  }
  func.func @transform_1(%arg0: i32) -> (i32, i32) {
    %c0_i32 = arith.constant 0 : i32
    %c0_i32_0 = arith.constant 0 : i32
    %c0_i32_1 = arith.constant 0 : i32
    return %c0_i32, %c0_i32_0 : i32, i32
  }
  func.func @transform_2(%arg0: i32) -> (i32, i32) {
    %c0_i32 = arith.constant 0 : i32
    %c0_i32_0 = arith.constant 0 : i32
    %c0_i32_1 = arith.constant 0 : i32
    return %c0_i32, %c0_i32_0 : i32, i32
  }
  func.func @transform_3(%arg0: i32) -> (i32, i32) {
    %c0_i32 = arith.constant 0 : i32
    %c0_i32_0 = arith.constant 0 : i32
    %c0_i32_1 = arith.constant 0 : i32
    return %c0_i32, %c0_i32_0 : i32, i32
  }
  func.func @transform_4(%arg0: i32) -> (i32, i32) {
    %c0_i32 = arith.constant 0 : i32
    %c0_i32_0 = arith.constant 0 : i32
    %c0_i32_1 = arith.constant 0 : i32
    return %c0_i32, %c0_i32_0 : i32, i32
  }
  func.func @transform_5(%arg0: i32) -> (i32, i32) {
    %c0_i32 = arith.constant 0 : i32
    %c0_i32_0 = arith.constant 0 : i32
    %c0_i32_1 = arith.constant 0 : i32
    return %c0_i32, %c0_i32_0 : i32, i32
  }
  func.func @transform_6(%arg0: i32) -> (i32, i32) {
    %c0_i32 = arith.constant 0 : i32
    %c0_i32_0 = arith.constant 0 : i32
    %c0_i32_1 = arith.constant 0 : i32
    return %c0_i32, %c0_i32_0 : i32, i32
  }
  func.func @transform_7(%arg0: i32) -> (i32, i32, i32) {
    %c0_i32 = arith.constant 0 : i32
    %c0_i32_0 = arith.constant 0 : i32
    %c0_i32_1 = arith.constant 0 : i32
    return %c0_i32, %arg0, %c0_i32_0 : i32, i32, i32
  }
}

module attributes {stable_mosaic.version = 11 : i64} {
  func.func @_gate_proj_first_kernel(%arg0: i32, %arg1: memref<64x32xf32, #tpu.memory_space<vmem>>, %arg2: memref<32x128xbf16, #tpu.memory_space<vmem>>, %arg3: memref<32x128xbf16, #tpu.memory_space<vmem>>, %arg4: memref<1x128xf32, #tpu.memory_space<vmem>>, %arg5: memref<1x128xf32, #tpu.memory_space<vmem>>, %arg6: memref<2x64x128xf32, #tpu.memory_space<vmem>>) attributes {dimension_semantics = [#tpu.dimension_semantics<parallel>], iteration_bounds = array<i64: 1>, scalar_prefetch = 0 : i64, scratch_operands = 0 : i64, tpu.core_type = #tpu.core_type<tc>, window_params = [{transform_indices = @transform_0, window_bounds = array<i64: 64, 32>}, {pipeline_mode = #tpu.pipeline_mode<synchronous>, transform_indices = @transform_1, window_bounds = array<i64: 32, 128>}, {pipeline_mode = #tpu.pipeline_mode<synchronous>, transform_indices = @transform_2, window_bounds = array<i64: 32, 128>}, {pipeline_mode = #tpu.pipeline_mode<synchronous>, transform_indices = @transform_3, window_bounds = array<i64: 1, 128>}, {pipeline_mode = #tpu.pipeline_mode<synchronous>, transform_indices = @transform_4, window_bounds = array<i64: 1, 128>}, {transform_indices = @transform_5, window_bounds = array<i64: 2, 64, 128>}]} {
    %c0 = arith.constant 0 : index
    %c0_0 = arith.constant 0 : index
    %0 = vector.load %arg1[%c0, %c0_0] : memref<64x32xf32, #tpu.memory_space<vmem>>, vector<64x32xf32>
    %1 = arith.truncf %0 : vector<64x32xf32> to vector<64x32xbf16>
    %c0_1 = arith.constant 0 : index
    %c0_2 = arith.constant 0 : index
    %2 = vector.load %arg2[%c0_1, %c0_2] : memref<32x128xbf16, #tpu.memory_space<vmem>>, vector<32x128xbf16>
    %cst = arith.constant dense<0.000000e+00> : vector<64x128xf32>
    %3 = tpu.matmul %1, %2, %cst {dimension_numbers = #tpu.dot_dimension_numbers<[1], [0], [0], [1], [0, 0, 1, 1], [], []>} : vector<64x32xbf16>, vector<32x128xbf16>, vector<64x128xf32> -> vector<64x128xf32>
    %c0_3 = arith.constant 0 : index
    %c0_4 = arith.constant 0 : index
    %4 = vector.load %arg4[%c0_3, %c0_4] : memref<1x128xf32, #tpu.memory_space<vmem>>, vector<1x128xf32>
    %5 = vector.broadcast %4 : vector<1x128xf32> to vector<64x128xf32>
    %6 = arith.addf %3, %5 : vector<64x128xf32>
    %c0_5 = arith.constant 0 : index
    %c0_6 = arith.constant 0 : index
    %c0_7 = arith.constant 0 : index
    %7 = vector.load %arg6[%c0_5, %c0_6, %c0_7] : memref<2x64x128xf32, #tpu.memory_space<vmem>>, vector<1x64x128xf32>
    %8 = vector.shape_cast %7 : vector<1x64x128xf32> to vector<64x128xf32>
    %9 = vector.shape_cast %6 : vector<64x128xf32> to vector<1x64x128xf32>
    tpu.vector_store %arg6[%c0_5, %c0_6, %c0_7], %9 {strides = array<i32>} : memref<2x64x128xf32, #tpu.memory_space<vmem>>, vector<1x64x128xf32>,
    %c0_8 = arith.constant 0 : index
    %c0_9 = arith.constant 0 : index
    %10 = vector.load %arg3[%c0_8, %c0_9] : memref<32x128xbf16, #tpu.memory_space<vmem>>, vector<32x128xbf16>
    %cst_10 = arith.constant dense<0.000000e+00> : vector<64x128xf32>
    %11 = tpu.matmul %1, %10, %cst_10 {dimension_numbers = #tpu.dot_dimension_numbers<[1], [0], [0], [1], [0, 0, 1, 1], [], []>} : vector<64x32xbf16>, vector<32x128xbf16>, vector<64x128xf32> -> vector<64x128xf32>
    %c0_11 = arith.constant 0 : index
    %c0_12 = arith.constant 0 : index
    %12 = vector.load %arg5[%c0_11, %c0_12] : memref<1x128xf32, #tpu.memory_space<vmem>>, vector<1x128xf32>
    %13 = vector.broadcast %12 : vector<1x128xf32> to vector<64x128xf32>
    %14 = arith.addf %11, %13 : vector<64x128xf32>
    %c1 = arith.constant 1 : index
    %c0_13 = arith.constant 0 : index
    %c0_14 = arith.constant 0 : index
    %15 = vector.load %arg6[%c1, %c0_13, %c0_14] : memref<2x64x128xf32, #tpu.memory_space<vmem>>, vector<1x64x128xf32>
    %16 = vector.shape_cast %15 : vector<1x64x128xf32> to vector<64x128xf32>
    %17 = vector.shape_cast %14 : vector<64x128xf32> to vector<1x64x128xf32>
    tpu.vector_store %arg6[%c1, %c0_13, %c0_14], %17 {strides = array<i32>} : memref<2x64x128xf32, #tpu.memory_space<vmem>>, vector<1x64x128xf32>,
    return
  }
  func.func @transform_0(%arg0: i32) -> (i32, i32) {
    %c0_i32 = arith.constant 0 : i32
    %c0_i32_0 = arith.constant 0 : i32
    return %arg0, %c0_i32 : i32, i32
  }
  func.func @transform_1(%arg0: i32) -> (i32, i32) {
    %c0_i32 = arith.constant 0 : i32
    %c0_i32_0 = arith.constant 0 : i32
    %c0_i32_1 = arith.constant 0 : i32
    return %c0_i32, %c0_i32_0 : i32, i32
  }
  func.func @transform_2(%arg0: i32) -> (i32, i32) {
    %c0_i32 = arith.constant 0 : i32
    %c0_i32_0 = arith.constant 0 : i32
    %c0_i32_1 = arith.constant 0 : i32
    return %c0_i32, %c0_i32_0 : i32, i32
  }
  func.func @transform_3(%arg0: i32) -> (i32, i32) {
    %c0_i32 = arith.constant 0 : i32
    %c0_i32_0 = arith.constant 0 : i32
    %c0_i32_1 = arith.constant 0 : i32
    return %c0_i32, %c0_i32_0 : i32, i32
  }
  func.func @transform_4(%arg0: i32) -> (i32, i32) {
    %c0_i32 = arith.constant 0 : i32
    %c0_i32_0 = arith.constant 0 : i32
    %c0_i32_1 = arith.constant 0 : i32
    return %c0_i32, %c0_i32_0 : i32, i32
  }
  func.func @transform_5(%arg0: i32) -> (i32, i32, i32) {
    %c0_i32 = arith.constant 0 : i32
    %c0_i32_0 = arith.constant 0 : i32
    %c0_i32_1 = arith.constant 0 : i32
    return %c0_i32, %arg0, %c0_i32_0 : i32, i32, i32
  }
}

module attributes {stable_mosaic.version = 11 : i64} {
  func.func @_dec_init_kernel(%arg0: i32, %arg1: memref<16x32xf32, #tpu.memory_space<vmem>>, %arg2: memref<16x32xf32, #tpu.memory_space<vmem>>, %arg3: memref<32x32xbf16, #tpu.memory_space<vmem>>, %arg4: memref<32x32xbf16, #tpu.memory_space<vmem>>, %arg5: memref<1x32xf32, #tpu.memory_space<vmem>>, %arg6: memref<16x32xf32, #tpu.memory_space<vmem>>, %arg7: memref<16x32xf32, #tpu.memory_space<vmem>>) attributes {dimension_semantics = [#tpu.dimension_semantics<arbitrary>], iteration_bounds = array<i64: 1>, scalar_prefetch = 0 : i64, scratch_operands = 0 : i64, tpu.core_type = #tpu.core_type<tc>, window_params = [{pipeline_mode = #tpu.pipeline_mode<synchronous>, transform_indices = @transform_0, window_bounds = array<i64: 16, 32>}, {pipeline_mode = #tpu.pipeline_mode<synchronous>, transform_indices = @transform_1, window_bounds = array<i64: 16, 32>}, {pipeline_mode = #tpu.pipeline_mode<synchronous>, transform_indices = @transform_2, window_bounds = array<i64: 32, 32>}, {pipeline_mode = #tpu.pipeline_mode<synchronous>, transform_indices = @transform_3, window_bounds = array<i64: 32, 32>}, {pipeline_mode = #tpu.pipeline_mode<synchronous>, transform_indices = @transform_4, window_bounds = array<i64: 1, 32>}, {pipeline_mode = #tpu.pipeline_mode<synchronous>, transform_indices = @transform_5, window_bounds = array<i64: 16, 32>}, {pipeline_mode = #tpu.pipeline_mode<synchronous>, transform_indices = @transform_6, window_bounds = array<i64: 16, 32>}]} {
    %c0 = arith.constant 0 : index
    %c0_0 = arith.constant 0 : index
    %0 = vector.load %arg1[%c0, %c0_0] : memref<16x32xf32, #tpu.memory_space<vmem>>, vector<16x32xf32>
    %1 = arith.truncf %0 : vector<16x32xf32> to vector<16x32xbf16>
    %c0_1 = arith.constant 0 : index
    %c0_2 = arith.constant 0 : index
    %2 = vector.load %arg3[%c0_1, %c0_2] : memref<32x32xbf16, #tpu.memory_space<vmem>>, vector<32x32xbf16>
    %cst = arith.constant dense<0.000000e+00> : vector<16x32xf32>
    %3 = tpu.matmul %1, %2, %cst {dimension_numbers = #tpu.dot_dimension_numbers<[1], [0], [0], [1], [0, 0, 1, 1], [], []>} : vector<16x32xbf16>, vector<32x32xbf16>, vector<16x32xf32> -> vector<16x32xf32>
    %c0_3 = arith.constant 0 : index
    %c0_4 = arith.constant 0 : index
    %4 = vector.load %arg2[%c0_3, %c0_4] : memref<16x32xf32, #tpu.memory_space<vmem>>, vector<16x32xf32>
    %5 = arith.truncf %4 : vector<16x32xf32> to vector<16x32xbf16>
    %c0_5 = arith.constant 0 : index
    %c0_6 = arith.constant 0 : index
    %6 = vector.load %arg4[%c0_5, %c0_6] : memref<32x32xbf16, #tpu.memory_space<vmem>>, vector<32x32xbf16>
    %cst_7 = arith.constant dense<0.000000e+00> : vector<16x32xf32>
    %7 = tpu.matmul %5, %6, %cst_7 {dimension_numbers = #tpu.dot_dimension_numbers<[1], [0], [0], [1], [0, 0, 1, 1], [], []>} : vector<16x32xbf16>, vector<32x32xbf16>, vector<16x32xf32> -> vector<16x32xf32>
    %8 = arith.addf %3, %7 : vector<16x32xf32>
    %c0_8 = arith.constant 0 : index
    %c0_9 = arith.constant 0 : index
    %9 = vector.load %arg5[%c0_8, %c0_9] : memref<1x32xf32, #tpu.memory_space<vmem>>, vector<1x32xf32>
    %10 = vector.broadcast %9 : vector<1x32xf32> to vector<16x32xf32>
    %11 = arith.addf %8, %10 : vector<16x32xf32>
    %c0_10 = arith.constant 0 : index
    %c0_11 = arith.constant 0 : index
    %12 = vector.load %arg6[%c0_10, %c0_11] : memref<16x32xf32, #tpu.memory_space<vmem>>, vector<16x32xf32>
    tpu.vector_store %arg6[%c0_10, %c0_11], %11 {strides = array<i32>} : memref<16x32xf32, #tpu.memory_space<vmem>>, vector<16x32xf32>,
    %13 = math.tanh %11 : vector<16x32xf32>
    %c0_12 = arith.constant 0 : index
    %c0_13 = arith.constant 0 : index
    %14 = vector.load %arg7[%c0_12, %c0_13] : memref<16x32xf32, #tpu.memory_space<vmem>>, vector<16x32xf32>
    tpu.vector_store %arg7[%c0_12, %c0_13], %13 {strides = array<i32>} : memref<16x32xf32, #tpu.memory_space<vmem>>, vector<16x32xf32>,
    return
  }
  func.func @transform_0(%arg0: i32) -> (i32, i32) {
    %c0_i32 = arith.constant 0 : i32
    %c0_i32_0 = arith.constant 0 : i32
    %c0_i32_1 = arith.constant 0 : i32
    return %c0_i32, %c0_i32_0 : i32, i32
  }
  func.func @transform_1(%arg0: i32) -> (i32, i32) {
    %c0_i32 = arith.constant 0 : i32
    %c0_i32_0 = arith.constant 0 : i32
    %c0_i32_1 = arith.constant 0 : i32
    return %c0_i32, %c0_i32_0 : i32, i32
  }
  func.func @transform_2(%arg0: i32) -> (i32, i32) {
    %c0_i32 = arith.constant 0 : i32
    %c0_i32_0 = arith.constant 0 : i32
    %c0_i32_1 = arith.constant 0 : i32
    return %c0_i32, %c0_i32_0 : i32, i32
  }
  func.func @transform_3(%arg0: i32) -> (i32, i32) {
    %c0_i32 = arith.constant 0 : i32
    %c0_i32_0 = arith.constant 0 : i32
    %c0_i32_1 = arith.constant 0 : i32
    return %c0_i32, %c0_i32_0 : i32, i32
  }
  func.func @transform_4(%arg0: i32) -> (i32, i32) {
    %c0_i32 = arith.constant 0 : i32
    %c0_i32_0 = arith.constant 0 : i32
    %c0_i32_1 = arith.constant 0 : i32
    return %c0_i32, %c0_i32_0 : i32, i32
  }
  func.func @transform_5(%arg0: i32) -> (i32, i32) {
    %c0_i32 = arith.constant 0 : i32
    %c0_i32_0 = arith.constant 0 : i32
    %c0_i32_1 = arith.constant 0 : i32
    return %c0_i32, %c0_i32_0 : i32, i32
  }
  func.func @transform_6(%arg0: i32) -> (i32, i32) {
    %c0_i32 = arith.constant 0 : i32
    %c0_i32_0 = arith.constant 0 : i32
    %c0_i32_1 = arith.constant 0 : i32
    return %c0_i32, %c0_i32_0 : i32, i32
  }
}

module attributes {stable_mosaic.version = 11 : i64} {
  func.func @_bilstm_kernel(%arg0: i32, %arg1: i32, %arg2: memref<8x1xi32, #tpu.memory_space<vmem>>, %arg3: memref<1x8x8x128xf32, #tpu.memory_space<vmem>>, %arg4: memref<1x32x128xbf16, #tpu.memory_space<vmem>>, %arg5: memref<1x8x8x32xf32, #tpu.memory_space<vmem>>, %arg6: memref<1x8x32xf32, #tpu.memory_space<vmem>>, %arg7: memref<8x32xf32, #tpu.memory_space<vmem>>, %arg8: memref<8x32xf32, #tpu.memory_space<vmem>>) attributes {dimension_semantics = [#tpu.dimension_semantics<parallel>, #tpu.dimension_semantics<arbitrary>], iteration_bounds = array<i64: 2, 1>, scalar_prefetch = 0 : i64, scratch_operands = 2 : i64, tpu.core_type = #tpu.core_type<tc>, window_params = [{pipeline_mode = #tpu.pipeline_mode<synchronous>, transform_indices = @transform_0, window_bounds = array<i64: 8, 1>}, {transform_indices = @transform_1, window_bounds = array<i64: 1, 8, 8, 128>}, {transform_indices = @transform_2, window_bounds = array<i64: 1, 32, 128>}, {transform_indices = @transform_3, window_bounds = array<i64: 1, 8, 8, 32>}, {transform_indices = @transform_4, window_bounds = array<i64: 1, 8, 32>}]} {
    %c0_i32 = arith.constant 0 : i32
    %0 = arith.cmpi eq, %arg1, %c0_i32 : i32
    %1 = arith.extui %0 : i1 to i32
    %c0_i32_0 = arith.constant 0 : i32
    %2 = arith.cmpi ne, %1, %c0_i32_0 : i32
    scf.if %2 {
      %cst_132 = arith.constant 0.000000e+00 : f32
      %443 = vector.broadcast %cst_132 : f32 to vector<8x32xf32>
      %c0_133 = arith.constant 0 : index
      %c0_134 = arith.constant 0 : index
      %444 = vector.load %arg7[%c0_133, %c0_134] : memref<8x32xf32, #tpu.memory_space<vmem>>, vector<8x32xf32>
      tpu.vector_store %arg7[%c0_133, %c0_134], %443 {strides = array<i32>} : memref<8x32xf32, #tpu.memory_space<vmem>>, vector<8x32xf32>,
      %cst_135 = arith.constant 0.000000e+00 : f32
      %445 = vector.broadcast %cst_135 : f32 to vector<8x32xf32>
      %c0_136 = arith.constant 0 : index
      %c0_137 = arith.constant 0 : index
      %446 = vector.load %arg8[%c0_136, %c0_137] : memref<8x32xf32, #tpu.memory_space<vmem>>, vector<8x32xf32>
      tpu.vector_store %arg8[%c0_136, %c0_137], %445 {strides = array<i32>} : memref<8x32xf32, #tpu.memory_space<vmem>>, vector<8x32xf32>,
    } else {
    }
    %c0 = arith.constant 0 : index
    %c0_1 = arith.constant 0 : index
    %3 = vector.load %arg2[%c0, %c0_1] : memref<8x1xi32, #tpu.memory_space<vmem>>, vector<8x1xi32>
    %c0_2 = arith.constant 0 : index
    %c0_3 = arith.constant 0 : index
    %c0_4 = arith.constant 0 : index
    %4 = vector.load %arg4[%c0_2, %c0_3, %c0_4] : memref<1x32x128xbf16, #tpu.memory_space<vmem>>, vector<1x32x128xbf16>
    %5 = vector.shape_cast %4 : vector<1x32x128xbf16> to vector<32x128xbf16>
    %c0_i32_5 = arith.constant 0 : i32
    %6 = arith.muli %arg0, %c0_i32_5 : i32
    %c2_i32 = arith.constant 2 : i32
    %7 = arith.muli %c2_i32, %arg0 : i32
    %c1_i32 = arith.constant 1 : i32
    %8 = arith.subi %c1_i32, %7 : i32
    %9 = arith.muli %8, %arg1 : i32
    %10 = arith.addi %6, %9 : i32
    %c8_i32 = arith.constant 8 : i32
    %11 = arith.muli %10, %c8_i32 : i32
    %c0_6 = arith.constant 0 : index
    %c0_7 = arith.constant 0 : index
    %12 = vector.load %arg7[%c0_6, %c0_7] : memref<8x32xf32, #tpu.memory_space<vmem>>, vector<8x32xf32>
    %c0_8 = arith.constant 0 : index
    %c0_9 = arith.constant 0 : index
    %13 = vector.load %arg8[%c0_8, %c0_9] : memref<8x32xf32, #tpu.memory_space<vmem>>, vector<8x32xf32>
    %c0_i32_10 = arith.constant 0 : i32
    %c7_i32 = arith.constant 7 : i32
    %14 = arith.muli %arg0, %c7_i32 : i32
    %c2_i32_11 = arith.constant 2 : i32
    %15 = arith.muli %c2_i32_11, %arg0 : i32
    %c1_i32_12 = arith.constant 1 : i32
    %16 = arith.subi %c1_i32_12, %15 : i32
    %17 = arith.muli %16, %c0_i32_10 : i32
    %18 = arith.addi %14, %17 : i32
    %c0_13 = arith.constant 0 : index
    %19 = arith.index_cast %18 : i32 to index
    %c0_14 = arith.constant 0 : index
    %c0_15 = arith.constant 0 : index
    %20 = vector.load %arg3[%c0_13, %19, %c0_14, %c0_15] : memref<1x8x8x128xf32, #tpu.memory_space<vmem>>, vector<1x1x8x128xf32>
    %21 = vector.shape_cast %20 : vector<1x1x8x128xf32> to vector<8x128xf32>
    %22 = arith.truncf %12 : vector<8x32xf32> to vector<8x32xbf16>
    %cst = arith.constant dense<0.000000e+00> : vector<8x128xf32>
    %23 = tpu.matmul %22, %5, %cst {dimension_numbers = #tpu.dot_dimension_numbers<[1], [0], [0], [1], [0, 0, 1, 1], [], []>} : vector<8x32xbf16>, vector<32x128xbf16>, vector<8x128xf32> -> vector<8x128xf32>
    %24 = arith.addf %21, %23 : vector<8x128xf32>
    %25 = vector.extract_strided_slice %24 {offsets = [0, 0], sizes = [8, 32], strides = [1, 1]} : vector<8x128xf32> to vector<8x32xf32>
    %26 = arith.negf %25 : vector<8x32xf32>
    %27 = math.exp %26 : vector<8x32xf32>
    %cst_16 = arith.constant 1.000000e+00 : f32
    %28 = vector.broadcast %cst_16 : f32 to vector<8x32xf32>
    %29 = arith.addf %28, %27 : vector<8x32xf32>
    %30 = arith.divf %28, %29 : vector<8x32xf32>
    %31 = vector.extract_strided_slice %24 {offsets = [0, 32], sizes = [8, 32], strides = [1, 1]} : vector<8x128xf32> to vector<8x32xf32>
    %32 = arith.negf %31 : vector<8x32xf32>
    %33 = math.exp %32 : vector<8x32xf32>
    %cst_17 = arith.constant 1.000000e+00 : f32
    %34 = vector.broadcast %cst_17 : f32 to vector<8x32xf32>
    %35 = arith.addf %34, %33 : vector<8x32xf32>
    %36 = arith.divf %34, %35 : vector<8x32xf32>
    %37 = vector.extract_strided_slice %24 {offsets = [0, 64], sizes = [8, 32], strides = [1, 1]} : vector<8x128xf32> to vector<8x32xf32>
    %38 = math.tanh %37 : vector<8x32xf32>
    %39 = vector.extract_strided_slice %24 {offsets = [0, 96], sizes = [8, 32], strides = [1, 1]} : vector<8x128xf32> to vector<8x32xf32>
    %40 = arith.negf %39 : vector<8x32xf32>
    %41 = math.exp %40 : vector<8x32xf32>
    %cst_18 = arith.constant 1.000000e+00 : f32
    %42 = vector.broadcast %cst_18 : f32 to vector<8x32xf32>
    %43 = arith.addf %42, %41 : vector<8x32xf32>
    %44 = arith.divf %42, %43 : vector<8x32xf32>
    %45 = arith.mulf %36, %13 : vector<8x32xf32>
    %46 = arith.mulf %30, %38 : vector<8x32xf32>
    %47 = arith.addf %45, %46 : vector<8x32xf32>
    %48 = math.tanh %47 : vector<8x32xf32>
    %49 = arith.mulf %44, %48 : vector<8x32xf32>
    %50 = arith.addi %11, %18 : i32
    %51 = vector.broadcast %50 : i32 to vector<8x1xi32>
    %52 = arith.cmpi slt, %51, %3 : vector<8x1xi32>
    %cst_19 = arith.constant 0.000000e+00 : f32
    %53 = vector.broadcast %cst_19 : f32 to vector<8x32xf32>
    %54 = vector.shape_cast %52 : vector<8x1xi1> to vector<8x1xi1>
    %55 = vector.broadcast %54 : vector<8x1xi1> to vector<8x32xi1>
    %56 = arith.select %55, %49, %53 : vector<8x32xi1>, vector<8x32xf32>
    %c0_20 = arith.constant 0 : index
    %57 = arith.index_cast %18 : i32 to index
    %c0_21 = arith.constant 0 : index
    %c0_22 = arith.constant 0 : index
    %58 = vector.load %arg5[%c0_20, %57, %c0_21, %c0_22] : memref<1x8x8x32xf32, #tpu.memory_space<vmem>>, vector<1x1x8x32xf32>
    %59 = vector.shape_cast %58 : vector<1x1x8x32xf32> to vector<8x32xf32>
    %60 = vector.shape_cast %56 : vector<8x32xf32> to vector<1x1x8x32xf32>
    tpu.vector_store %arg5[%c0_20, %57, %c0_21, %c0_22], %60 {strides = array<i32>} : memref<1x8x8x32xf32, #tpu.memory_space<vmem>>, vector<1x1x8x32xf32>,
    %61 = vector.shape_cast %52 : vector<8x1xi1> to vector<8x1xi1>
    %62 = vector.broadcast %61 : vector<8x1xi1> to vector<8x32xi1>
    %63 = arith.select %62, %49, %12 : vector<8x32xi1>, vector<8x32xf32>
    %64 = vector.shape_cast %52 : vector<8x1xi1> to vector<8x1xi1>
    %65 = vector.broadcast %64 : vector<8x1xi1> to vector<8x32xi1>
    %66 = arith.select %65, %47, %13 : vector<8x32xi1>, vector<8x32xf32>
    %c1_i32_23 = arith.constant 1 : i32
    %c7_i32_24 = arith.constant 7 : i32
    %67 = arith.muli %arg0, %c7_i32_24 : i32
    %c2_i32_25 = arith.constant 2 : i32
    %68 = arith.muli %c2_i32_25, %arg0 : i32
    %c1_i32_26 = arith.constant 1 : i32
    %69 = arith.subi %c1_i32_26, %68 : i32
    %70 = arith.muli %69, %c1_i32_23 : i32
    %71 = arith.addi %67, %70 : i32
    %c0_27 = arith.constant 0 : index
    %72 = arith.index_cast %71 : i32 to index
    %c0_28 = arith.constant 0 : index
    %c0_29 = arith.constant 0 : index
    %73 = vector.load %arg3[%c0_27, %72, %c0_28, %c0_29] : memref<1x8x8x128xf32, #tpu.memory_space<vmem>>, vector<1x1x8x128xf32>
    %74 = vector.shape_cast %73 : vector<1x1x8x128xf32> to vector<8x128xf32>
    %75 = arith.truncf %63 : vector<8x32xf32> to vector<8x32xbf16>
    %cst_30 = arith.constant dense<0.000000e+00> : vector<8x128xf32>
    %76 = tpu.matmul %75, %5, %cst_30 {dimension_numbers = #tpu.dot_dimension_numbers<[1], [0], [0], [1], [0, 0, 1, 1], [], []>} : vector<8x32xbf16>, vector<32x128xbf16>, vector<8x128xf32> -> vector<8x128xf32>
    %77 = arith.addf %74, %76 : vector<8x128xf32>
    %78 = vector.extract_strided_slice %77 {offsets = [0, 0], sizes = [8, 32], strides = [1, 1]} : vector<8x128xf32> to vector<8x32xf32>
    %79 = arith.negf %78 : vector<8x32xf32>
    %80 = math.exp %79 : vector<8x32xf32>
    %cst_31 = arith.constant 1.000000e+00 : f32
    %81 = vector.broadcast %cst_31 : f32 to vector<8x32xf32>
    %82 = arith.addf %81, %80 : vector<8x32xf32>
    %83 = arith.divf %81, %82 : vector<8x32xf32>
    %84 = vector.extract_strided_slice %77 {offsets = [0, 32], sizes = [8, 32], strides = [1, 1]} : vector<8x128xf32> to vector<8x32xf32>
    %85 = arith.negf %84 : vector<8x32xf32>
    %86 = math.exp %85 : vector<8x32xf32>
    %cst_32 = arith.constant 1.000000e+00 : f32
    %87 = vector.broadcast %cst_32 : f32 to vector<8x32xf32>
    %88 = arith.addf %87, %86 : vector<8x32xf32>
    %89 = arith.divf %87, %88 : vector<8x32xf32>
    %90 = vector.extract_strided_slice %77 {offsets = [0, 64], sizes = [8, 32], strides = [1, 1]} : vector<8x128xf32> to vector<8x32xf32>
    %91 = math.tanh %90 : vector<8x32xf32>
    %92 = vector.extract_strided_slice %77 {offsets = [0, 96], sizes = [8, 32], strides = [1, 1]} : vector<8x128xf32> to vector<8x32xf32>
    %93 = arith.negf %92 : vector<8x32xf32>
    %94 = math.exp %93 : vector<8x32xf32>
    %cst_33 = arith.constant 1.000000e+00 : f32
    %95 = vector.broadcast %cst_33 : f32 to vector<8x32xf32>
    %96 = arith.addf %95, %94 : vector<8x32xf32>
    %97 = arith.divf %95, %96 : vector<8x32xf32>
    %98 = arith.mulf %89, %66 : vector<8x32xf32>
    %99 = arith.mulf %83, %91 : vector<8x32xf32>
    %100 = arith.addf %98, %99 : vector<8x32xf32>
    %101 = math.tanh %100 : vector<8x32xf32>
    %102 = arith.mulf %97, %101 : vector<8x32xf32>
    %103 = arith.addi %11, %71 : i32
    %104 = vector.broadcast %103 : i32 to vector<8x1xi32>
    %105 = arith.cmpi slt, %104, %3 : vector<8x1xi32>
    %cst_34 = arith.constant 0.000000e+00 : f32
    %106 = vector.broadcast %cst_34 : f32 to vector<8x32xf32>
    %107 = vector.shape_cast %105 : vector<8x1xi1> to vector<8x1xi1>
    %108 = vector.broadcast %107 : vector<8x1xi1> to vector<8x32xi1>
    %109 = arith.select %108, %102, %106 : vector<8x32xi1>, vector<8x32xf32>
    %c0_35 = arith.constant 0 : index
    %110 = arith.index_cast %71 : i32 to index
    %c0_36 = arith.constant 0 : index
    %c0_37 = arith.constant 0 : index
    %111 = vector.load %arg5[%c0_35, %110, %c0_36, %c0_37] : memref<1x8x8x32xf32, #tpu.memory_space<vmem>>, vector<1x1x8x32xf32>
    %112 = vector.shape_cast %111 : vector<1x1x8x32xf32> to vector<8x32xf32>
    %113 = vector.shape_cast %109 : vector<8x32xf32> to vector<1x1x8x32xf32>
    tpu.vector_store %arg5[%c0_35, %110, %c0_36, %c0_37], %113 {strides = array<i32>} : memref<1x8x8x32xf32, #tpu.memory_space<vmem>>, vector<1x1x8x32xf32>,
    %114 = vector.shape_cast %105 : vector<8x1xi1> to vector<8x1xi1>
    %115 = vector.broadcast %114 : vector<8x1xi1> to vector<8x32xi1>
    %116 = arith.select %115, %102, %63 : vector<8x32xi1>, vector<8x32xf32>
    %117 = vector.shape_cast %105 : vector<8x1xi1> to vector<8x1xi1>
    %118 = vector.broadcast %117 : vector<8x1xi1> to vector<8x32xi1>
    %119 = arith.select %118, %100, %66 : vector<8x32xi1>, vector<8x32xf32>
    %c2_i32_38 = arith.constant 2 : i32
    %c7_i32_39 = arith.constant 7 : i32
    %120 = arith.muli %arg0, %c7_i32_39 : i32
    %c2_i32_40 = arith.constant 2 : i32
    %121 = arith.muli %c2_i32_40, %arg0 : i32
    %c1_i32_41 = arith.constant 1 : i32
    %122 = arith.subi %c1_i32_41, %121 : i32
    %123 = arith.muli %122, %c2_i32_38 : i32
    %124 = arith.addi %120, %123 : i32
    %c0_42 = arith.constant 0 : index
    %125 = arith.index_cast %124 : i32 to index
    %c0_43 = arith.constant 0 : index
    %c0_44 = arith.constant 0 : index
    %126 = vector.load %arg3[%c0_42, %125, %c0_43, %c0_44] : memref<1x8x8x128xf32, #tpu.memory_space<vmem>>, vector<1x1x8x128xf32>
    %127 = vector.shape_cast %126 : vector<1x1x8x128xf32> to vector<8x128xf32>
    %128 = arith.truncf %116 : vector<8x32xf32> to vector<8x32xbf16>
    %cst_45 = arith.constant dense<0.000000e+00> : vector<8x128xf32>
    %129 = tpu.matmul %128, %5, %cst_45 {dimension_numbers = #tpu.dot_dimension_numbers<[1], [0], [0], [1], [0, 0, 1, 1], [], []>} : vector<8x32xbf16>, vector<32x128xbf16>, vector<8x128xf32> -> vector<8x128xf32>
    %130 = arith.addf %127, %129 : vector<8x128xf32>
    %131 = vector.extract_strided_slice %130 {offsets = [0, 0], sizes = [8, 32], strides = [1, 1]} : vector<8x128xf32> to vector<8x32xf32>
    %132 = arith.negf %131 : vector<8x32xf32>
    %133 = math.exp %132 : vector<8x32xf32>
    %cst_46 = arith.constant 1.000000e+00 : f32
    %134 = vector.broadcast %cst_46 : f32 to vector<8x32xf32>
    %135 = arith.addf %134, %133 : vector<8x32xf32>
    %136 = arith.divf %134, %135 : vector<8x32xf32>
    %137 = vector.extract_strided_slice %130 {offsets = [0, 32], sizes = [8, 32], strides = [1, 1]} : vector<8x128xf32> to vector<8x32xf32>
    %138 = arith.negf %137 : vector<8x32xf32>
    %139 = math.exp %138 : vector<8x32xf32>
    %cst_47 = arith.constant 1.000000e+00 : f32
    %140 = vector.broadcast %cst_47 : f32 to vector<8x32xf32>
    %141 = arith.addf %140, %139 : vector<8x32xf32>
    %142 = arith.divf %140, %141 : vector<8x32xf32>
    %143 = vector.extract_strided_slice %130 {offsets = [0, 64], sizes = [8, 32], strides = [1, 1]} : vector<8x128xf32> to vector<8x32xf32>
    %144 = math.tanh %143 : vector<8x32xf32>
    %145 = vector.extract_strided_slice %130 {offsets = [0, 96], sizes = [8, 32], strides = [1, 1]} : vector<8x128xf32> to vector<8x32xf32>
    %146 = arith.negf %145 : vector<8x32xf32>
    %147 = math.exp %146 : vector<8x32xf32>
    %cst_48 = arith.constant 1.000000e+00 : f32
    %148 = vector.broadcast %cst_48 : f32 to vector<8x32xf32>
    %149 = arith.addf %148, %147 : vector<8x32xf32>
    %150 = arith.divf %148, %149 : vector<8x32xf32>
    %151 = arith.mulf %142, %119 : vector<8x32xf32>
    %152 = arith.mulf %136, %144 : vector<8x32xf32>
    %153 = arith.addf %151, %152 : vector<8x32xf32>
    %154 = math.tanh %153 : vector<8x32xf32>
    %155 = arith.mulf %150, %154 : vector<8x32xf32>
    %156 = arith.addi %11, %124 : i32
    %157 = vector.broadcast %156 : i32 to vector<8x1xi32>
    %158 = arith.cmpi slt, %157, %3 : vector<8x1xi32>
    %cst_49 = arith.constant 0.000000e+00 : f32
    %159 = vector.broadcast %cst_49 : f32 to vector<8x32xf32>
    %160 = vector.shape_cast %158 : vector<8x1xi1> to vector<8x1xi1>
    %161 = vector.broadcast %160 : vector<8x1xi1> to vector<8x32xi1>
    %162 = arith.select %161, %155, %159 : vector<8x32xi1>, vector<8x32xf32>
    %c0_50 = arith.constant 0 : index
    %163 = arith.index_cast %124 : i32 to index
    %c0_51 = arith.constant 0 : index
    %c0_52 = arith.constant 0 : index
    %164 = vector.load %arg5[%c0_50, %163, %c0_51, %c0_52] : memref<1x8x8x32xf32, #tpu.memory_space<vmem>>, vector<1x1x8x32xf32>
    %165 = vector.shape_cast %164 : vector<1x1x8x32xf32> to vector<8x32xf32>
    %166 = vector.shape_cast %162 : vector<8x32xf32> to vector<1x1x8x32xf32>
    tpu.vector_store %arg5[%c0_50, %163, %c0_51, %c0_52], %166 {strides = array<i32>} : memref<1x8x8x32xf32, #tpu.memory_space<vmem>>, vector<1x1x8x32xf32>,
    %167 = vector.shape_cast %158 : vector<8x1xi1> to vector<8x1xi1>
    %168 = vector.broadcast %167 : vector<8x1xi1> to vector<8x32xi1>
    %169 = arith.select %168, %155, %116 : vector<8x32xi1>, vector<8x32xf32>
    %170 = vector.shape_cast %158 : vector<8x1xi1> to vector<8x1xi1>
    %171 = vector.broadcast %170 : vector<8x1xi1> to vector<8x32xi1>
    %172 = arith.select %171, %153, %119 : vector<8x32xi1>, vector<8x32xf32>
    %c3_i32 = arith.constant 3 : i32
    %c7_i32_53 = arith.constant 7 : i32
    %173 = arith.muli %arg0, %c7_i32_53 : i32
    %c2_i32_54 = arith.constant 2 : i32
    %174 = arith.muli %c2_i32_54, %arg0 : i32
    %c1_i32_55 = arith.constant 1 : i32
    %175 = arith.subi %c1_i32_55, %174 : i32
    %176 = arith.muli %175, %c3_i32 : i32
    %177 = arith.addi %173, %176 : i32
    %c0_56 = arith.constant 0 : index
    %178 = arith.index_cast %177 : i32 to index
    %c0_57 = arith.constant 0 : index
    %c0_58 = arith.constant 0 : index
    %179 = vector.load %arg3[%c0_56, %178, %c0_57, %c0_58] : memref<1x8x8x128xf32, #tpu.memory_space<vmem>>, vector<1x1x8x128xf32>
    %180 = vector.shape_cast %179 : vector<1x1x8x128xf32> to vector<8x128xf32>
    %181 = arith.truncf %169 : vector<8x32xf32> to vector<8x32xbf16>
    %cst_59 = arith.constant dense<0.000000e+00> : vector<8x128xf32>
    %182 = tpu.matmul %181, %5, %cst_59 {dimension_numbers = #tpu.dot_dimension_numbers<[1], [0], [0], [1], [0, 0, 1, 1], [], []>} : vector<8x32xbf16>, vector<32x128xbf16>, vector<8x128xf32> -> vector<8x128xf32>
    %183 = arith.addf %180, %182 : vector<8x128xf32>
    %184 = vector.extract_strided_slice %183 {offsets = [0, 0], sizes = [8, 32], strides = [1, 1]} : vector<8x128xf32> to vector<8x32xf32>
    %185 = arith.negf %184 : vector<8x32xf32>
    %186 = math.exp %185 : vector<8x32xf32>
    %cst_60 = arith.constant 1.000000e+00 : f32
    %187 = vector.broadcast %cst_60 : f32 to vector<8x32xf32>
    %188 = arith.addf %187, %186 : vector<8x32xf32>
    %189 = arith.divf %187, %188 : vector<8x32xf32>
    %190 = vector.extract_strided_slice %183 {offsets = [0, 32], sizes = [8, 32], strides = [1, 1]} : vector<8x128xf32> to vector<8x32xf32>
    %191 = arith.negf %190 : vector<8x32xf32>
    %192 = math.exp %191 : vector<8x32xf32>
    %cst_61 = arith.constant 1.000000e+00 : f32
    %193 = vector.broadcast %cst_61 : f32 to vector<8x32xf32>
    %194 = arith.addf %193, %192 : vector<8x32xf32>
    %195 = arith.divf %193, %194 : vector<8x32xf32>
    %196 = vector.extract_strided_slice %183 {offsets = [0, 64], sizes = [8, 32], strides = [1, 1]} : vector<8x128xf32> to vector<8x32xf32>
    %197 = math.tanh %196 : vector<8x32xf32>
    %198 = vector.extract_strided_slice %183 {offsets = [0, 96], sizes = [8, 32], strides = [1, 1]} : vector<8x128xf32> to vector<8x32xf32>
    %199 = arith.negf %198 : vector<8x32xf32>
    %200 = math.exp %199 : vector<8x32xf32>
    %cst_62 = arith.constant 1.000000e+00 : f32
    %201 = vector.broadcast %cst_62 : f32 to vector<8x32xf32>
    %202 = arith.addf %201, %200 : vector<8x32xf32>
    %203 = arith.divf %201, %202 : vector<8x32xf32>
    %204 = arith.mulf %195, %172 : vector<8x32xf32>
    %205 = arith.mulf %189, %197 : vector<8x32xf32>
    %206 = arith.addf %204, %205 : vector<8x32xf32>
    %207 = math.tanh %206 : vector<8x32xf32>
    %208 = arith.mulf %203, %207 : vector<8x32xf32>
    %209 = arith.addi %11, %177 : i32
    %210 = vector.broadcast %209 : i32 to vector<8x1xi32>
    %211 = arith.cmpi slt, %210, %3 : vector<8x1xi32>
    %cst_63 = arith.constant 0.000000e+00 : f32
    %212 = vector.broadcast %cst_63 : f32 to vector<8x32xf32>
    %213 = vector.shape_cast %211 : vector<8x1xi1> to vector<8x1xi1>
    %214 = vector.broadcast %213 : vector<8x1xi1> to vector<8x32xi1>
    %215 = arith.select %214, %208, %212 : vector<8x32xi1>, vector<8x32xf32>
    %c0_64 = arith.constant 0 : index
    %216 = arith.index_cast %177 : i32 to index
    %c0_65 = arith.constant 0 : index
    %c0_66 = arith.constant 0 : index
    %217 = vector.load %arg5[%c0_64, %216, %c0_65, %c0_66] : memref<1x8x8x32xf32, #tpu.memory_space<vmem>>, vector<1x1x8x32xf32>
    %218 = vector.shape_cast %217 : vector<1x1x8x32xf32> to vector<8x32xf32>
    %219 = vector.shape_cast %215 : vector<8x32xf32> to vector<1x1x8x32xf32>
    tpu.vector_store %arg5[%c0_64, %216, %c0_65, %c0_66], %219 {strides = array<i32>} : memref<1x8x8x32xf32, #tpu.memory_space<vmem>>, vector<1x1x8x32xf32>,
    %220 = vector.shape_cast %211 : vector<8x1xi1> to vector<8x1xi1>
    %221 = vector.broadcast %220 : vector<8x1xi1> to vector<8x32xi1>
    %222 = arith.select %221, %208, %169 : vector<8x32xi1>, vector<8x32xf32>
    %223 = vector.shape_cast %211 : vector<8x1xi1> to vector<8x1xi1>
    %224 = vector.broadcast %223 : vector<8x1xi1> to vector<8x32xi1>
    %225 = arith.select %224, %206, %172 : vector<8x32xi1>, vector<8x32xf32>
    %c4_i32 = arith.constant 4 : i32
    %c7_i32_67 = arith.constant 7 : i32
    %226 = arith.muli %arg0, %c7_i32_67 : i32
    %c2_i32_68 = arith.constant 2 : i32
    %227 = arith.muli %c2_i32_68, %arg0 : i32
    %c1_i32_69 = arith.constant 1 : i32
    %228 = arith.subi %c1_i32_69, %227 : i32
    %229 = arith.muli %228, %c4_i32 : i32
    %230 = arith.addi %226, %229 : i32
    %c0_70 = arith.constant 0 : index
    %231 = arith.index_cast %230 : i32 to index
    %c0_71 = arith.constant 0 : index
    %c0_72 = arith.constant 0 : index
    %232 = vector.load %arg3[%c0_70, %231, %c0_71, %c0_72] : memref<1x8x8x128xf32, #tpu.memory_space<vmem>>, vector<1x1x8x128xf32>
    %233 = vector.shape_cast %232 : vector<1x1x8x128xf32> to vector<8x128xf32>
    %234 = arith.truncf %222 : vector<8x32xf32> to vector<8x32xbf16>
    %cst_73 = arith.constant dense<0.000000e+00> : vector<8x128xf32>
    %235 = tpu.matmul %234, %5, %cst_73 {dimension_numbers = #tpu.dot_dimension_numbers<[1], [0], [0], [1], [0, 0, 1, 1], [], []>} : vector<8x32xbf16>, vector<32x128xbf16>, vector<8x128xf32> -> vector<8x128xf32>
    %236 = arith.addf %233, %235 : vector<8x128xf32>
    %237 = vector.extract_strided_slice %236 {offsets = [0, 0], sizes = [8, 32], strides = [1, 1]} : vector<8x128xf32> to vector<8x32xf32>
    %238 = arith.negf %237 : vector<8x32xf32>
    %239 = math.exp %238 : vector<8x32xf32>
    %cst_74 = arith.constant 1.000000e+00 : f32
    %240 = vector.broadcast %cst_74 : f32 to vector<8x32xf32>
    %241 = arith.addf %240, %239 : vector<8x32xf32>
    %242 = arith.divf %240, %241 : vector<8x32xf32>
    %243 = vector.extract_strided_slice %236 {offsets = [0, 32], sizes = [8, 32], strides = [1, 1]} : vector<8x128xf32> to vector<8x32xf32>
    %244 = arith.negf %243 : vector<8x32xf32>
    %245 = math.exp %244 : vector<8x32xf32>
    %cst_75 = arith.constant 1.000000e+00 : f32
    %246 = vector.broadcast %cst_75 : f32 to vector<8x32xf32>
    %247 = arith.addf %246, %245 : vector<8x32xf32>
    %248 = arith.divf %246, %247 : vector<8x32xf32>
    %249 = vector.extract_strided_slice %236 {offsets = [0, 64], sizes = [8, 32], strides = [1, 1]} : vector<8x128xf32> to vector<8x32xf32>
    %250 = math.tanh %249 : vector<8x32xf32>
    %251 = vector.extract_strided_slice %236 {offsets = [0, 96], sizes = [8, 32], strides = [1, 1]} : vector<8x128xf32> to vector<8x32xf32>
    %252 = arith.negf %251 : vector<8x32xf32>
    %253 = math.exp %252 : vector<8x32xf32>
    %cst_76 = arith.constant 1.000000e+00 : f32
    %254 = vector.broadcast %cst_76 : f32 to vector<8x32xf32>
    %255 = arith.addf %254, %253 : vector<8x32xf32>
    %256 = arith.divf %254, %255 : vector<8x32xf32>
    %257 = arith.mulf %248, %225 : vector<8x32xf32>
    %258 = arith.mulf %242, %250 : vector<8x32xf32>
    %259 = arith.addf %257, %258 : vector<8x32xf32>
    %260 = math.tanh %259 : vector<8x32xf32>
    %261 = arith.mulf %256, %260 : vector<8x32xf32>
    %262 = arith.addi %11, %230 : i32
    %263 = vector.broadcast %262 : i32 to vector<8x1xi32>
    %264 = arith.cmpi slt, %263, %3 : vector<8x1xi32>
    %cst_77 = arith.constant 0.000000e+00 : f32
    %265 = vector.broadcast %cst_77 : f32 to vector<8x32xf32>
    %266 = vector.shape_cast %264 : vector<8x1xi1> to vector<8x1xi1>
    %267 = vector.broadcast %266 : vector<8x1xi1> to vector<8x32xi1>
    %268 = arith.select %267, %261, %265 : vector<8x32xi1>, vector<8x32xf32>
    %c0_78 = arith.constant 0 : index
    %269 = arith.index_cast %230 : i32 to index
    %c0_79 = arith.constant 0 : index
    %c0_80 = arith.constant 0 : index
    %270 = vector.load %arg5[%c0_78, %269, %c0_79, %c0_80] : memref<1x8x8x32xf32, #tpu.memory_space<vmem>>, vector<1x1x8x32xf32>
    %271 = vector.shape_cast %270 : vector<1x1x8x32xf32> to vector<8x32xf32>
    %272 = vector.shape_cast %268 : vector<8x32xf32> to vector<1x1x8x32xf32>
    tpu.vector_store %arg5[%c0_78, %269, %c0_79, %c0_80], %272 {strides = array<i32>} : memref<1x8x8x32xf32, #tpu.memory_space<vmem>>, vector<1x1x8x32xf32>,
    %273 = vector.shape_cast %264 : vector<8x1xi1> to vector<8x1xi1>
    %274 = vector.broadcast %273 : vector<8x1xi1> to vector<8x32xi1>
    %275 = arith.select %274, %261, %222 : vector<8x32xi1>, vector<8x32xf32>
    %276 = vector.shape_cast %264 : vector<8x1xi1> to vector<8x1xi1>
    %277 = vector.broadcast %276 : vector<8x1xi1> to vector<8x32xi1>
    %278 = arith.select %277, %259, %225 : vector<8x32xi1>, vector<8x32xf32>
    %c5_i32 = arith.constant 5 : i32
    %c7_i32_81 = arith.constant 7 : i32
    %279 = arith.muli %arg0, %c7_i32_81 : i32
    %c2_i32_82 = arith.constant 2 : i32
    %280 = arith.muli %c2_i32_82, %arg0 : i32
    %c1_i32_83 = arith.constant 1 : i32
    %281 = arith.subi %c1_i32_83, %280 : i32
    %282 = arith.muli %281, %c5_i32 : i32
    %283 = arith.addi %279, %282 : i32
    %c0_84 = arith.constant 0 : index
    %284 = arith.index_cast %283 : i32 to index
    %c0_85 = arith.constant 0 : index
    %c0_86 = arith.constant 0 : index
    %285 = vector.load %arg3[%c0_84, %284, %c0_85, %c0_86] : memref<1x8x8x128xf32, #tpu.memory_space<vmem>>, vector<1x1x8x128xf32>
    %286 = vector.shape_cast %285 : vector<1x1x8x128xf32> to vector<8x128xf32>
    %287 = arith.truncf %275 : vector<8x32xf32> to vector<8x32xbf16>
    %cst_87 = arith.constant dense<0.000000e+00> : vector<8x128xf32>
    %288 = tpu.matmul %287, %5, %cst_87 {dimension_numbers = #tpu.dot_dimension_numbers<[1], [0], [0], [1], [0, 0, 1, 1], [], []>} : vector<8x32xbf16>, vector<32x128xbf16>, vector<8x128xf32> -> vector<8x128xf32>
    %289 = arith.addf %286, %288 : vector<8x128xf32>
    %290 = vector.extract_strided_slice %289 {offsets = [0, 0], sizes = [8, 32], strides = [1, 1]} : vector<8x128xf32> to vector<8x32xf32>
    %291 = arith.negf %290 : vector<8x32xf32>
    %292 = math.exp %291 : vector<8x32xf32>
    %cst_88 = arith.constant 1.000000e+00 : f32
    %293 = vector.broadcast %cst_88 : f32 to vector<8x32xf32>
    %294 = arith.addf %293, %292 : vector<8x32xf32>
    %295 = arith.divf %293, %294 : vector<8x32xf32>
    %296 = vector.extract_strided_slice %289 {offsets = [0, 32], sizes = [8, 32], strides = [1, 1]} : vector<8x128xf32> to vector<8x32xf32>
    %297 = arith.negf %296 : vector<8x32xf32>
    %298 = math.exp %297 : vector<8x32xf32>
    %cst_89 = arith.constant 1.000000e+00 : f32
    %299 = vector.broadcast %cst_89 : f32 to vector<8x32xf32>
    %300 = arith.addf %299, %298 : vector<8x32xf32>
    %301 = arith.divf %299, %300 : vector<8x32xf32>
    %302 = vector.extract_strided_slice %289 {offsets = [0, 64], sizes = [8, 32], strides = [1, 1]} : vector<8x128xf32> to vector<8x32xf32>
    %303 = math.tanh %302 : vector<8x32xf32>
    %304 = vector.extract_strided_slice %289 {offsets = [0, 96], sizes = [8, 32], strides = [1, 1]} : vector<8x128xf32> to vector<8x32xf32>
    %305 = arith.negf %304 : vector<8x32xf32>
    %306 = math.exp %305 : vector<8x32xf32>
    %cst_90 = arith.constant 1.000000e+00 : f32
    %307 = vector.broadcast %cst_90 : f32 to vector<8x32xf32>
    %308 = arith.addf %307, %306 : vector<8x32xf32>
    %309 = arith.divf %307, %308 : vector<8x32xf32>
    %310 = arith.mulf %301, %278 : vector<8x32xf32>
    %311 = arith.mulf %295, %303 : vector<8x32xf32>
    %312 = arith.addf %310, %311 : vector<8x32xf32>
    %313 = math.tanh %312 : vector<8x32xf32>
    %314 = arith.mulf %309, %313 : vector<8x32xf32>
    %315 = arith.addi %11, %283 : i32
    %316 = vector.broadcast %315 : i32 to vector<8x1xi32>
    %317 = arith.cmpi slt, %316, %3 : vector<8x1xi32>
    %cst_91 = arith.constant 0.000000e+00 : f32
    %318 = vector.broadcast %cst_91 : f32 to vector<8x32xf32>
    %319 = vector.shape_cast %317 : vector<8x1xi1> to vector<8x1xi1>
    %320 = vector.broadcast %319 : vector<8x1xi1> to vector<8x32xi1>
    %321 = arith.select %320, %314, %318 : vector<8x32xi1>, vector<8x32xf32>
    %c0_92 = arith.constant 0 : index
    %322 = arith.index_cast %283 : i32 to index
    %c0_93 = arith.constant 0 : index
    %c0_94 = arith.constant 0 : index
    %323 = vector.load %arg5[%c0_92, %322, %c0_93, %c0_94] : memref<1x8x8x32xf32, #tpu.memory_space<vmem>>, vector<1x1x8x32xf32>
    %324 = vector.shape_cast %323 : vector<1x1x8x32xf32> to vector<8x32xf32>
    %325 = vector.shape_cast %321 : vector<8x32xf32> to vector<1x1x8x32xf32>
    tpu.vector_store %arg5[%c0_92, %322, %c0_93, %c0_94], %325 {strides = array<i32>} : memref<1x8x8x32xf32, #tpu.memory_space<vmem>>, vector<1x1x8x32xf32>,
    %326 = vector.shape_cast %317 : vector<8x1xi1> to vector<8x1xi1>
    %327 = vector.broadcast %326 : vector<8x1xi1> to vector<8x32xi1>
    %328 = arith.select %327, %314, %275 : vector<8x32xi1>, vector<8x32xf32>
    %329 = vector.shape_cast %317 : vector<8x1xi1> to vector<8x1xi1>
    %330 = vector.broadcast %329 : vector<8x1xi1> to vector<8x32xi1>
    %331 = arith.select %330, %312, %278 : vector<8x32xi1>, vector<8x32xf32>
    %c6_i32 = arith.constant 6 : i32
    %c7_i32_95 = arith.constant 7 : i32
    %332 = arith.muli %arg0, %c7_i32_95 : i32
    %c2_i32_96 = arith.constant 2 : i32
    %333 = arith.muli %c2_i32_96, %arg0 : i32
    %c1_i32_97 = arith.constant 1 : i32
    %334 = arith.subi %c1_i32_97, %333 : i32
    %335 = arith.muli %334, %c6_i32 : i32
    %336 = arith.addi %332, %335 : i32
    %c0_98 = arith.constant 0 : index
    %337 = arith.index_cast %336 : i32 to index
    %c0_99 = arith.constant 0 : index
    %c0_100 = arith.constant 0 : index
    %338 = vector.load %arg3[%c0_98, %337, %c0_99, %c0_100] : memref<1x8x8x128xf32, #tpu.memory_space<vmem>>, vector<1x1x8x128xf32>
    %339 = vector.shape_cast %338 : vector<1x1x8x128xf32> to vector<8x128xf32>
    %340 = arith.truncf %328 : vector<8x32xf32> to vector<8x32xbf16>
    %cst_101 = arith.constant dense<0.000000e+00> : vector<8x128xf32>
    %341 = tpu.matmul %340, %5, %cst_101 {dimension_numbers = #tpu.dot_dimension_numbers<[1], [0], [0], [1], [0, 0, 1, 1], [], []>} : vector<8x32xbf16>, vector<32x128xbf16>, vector<8x128xf32> -> vector<8x128xf32>
    %342 = arith.addf %339, %341 : vector<8x128xf32>
    %343 = vector.extract_strided_slice %342 {offsets = [0, 0], sizes = [8, 32], strides = [1, 1]} : vector<8x128xf32> to vector<8x32xf32>
    %344 = arith.negf %343 : vector<8x32xf32>
    %345 = math.exp %344 : vector<8x32xf32>
    %cst_102 = arith.constant 1.000000e+00 : f32
    %346 = vector.broadcast %cst_102 : f32 to vector<8x32xf32>
    %347 = arith.addf %346, %345 : vector<8x32xf32>
    %348 = arith.divf %346, %347 : vector<8x32xf32>
    %349 = vector.extract_strided_slice %342 {offsets = [0, 32], sizes = [8, 32], strides = [1, 1]} : vector<8x128xf32> to vector<8x32xf32>
    %350 = arith.negf %349 : vector<8x32xf32>
    %351 = math.exp %350 : vector<8x32xf32>
    %cst_103 = arith.constant 1.000000e+00 : f32
    %352 = vector.broadcast %cst_103 : f32 to vector<8x32xf32>
    %353 = arith.addf %352, %351 : vector<8x32xf32>
    %354 = arith.divf %352, %353 : vector<8x32xf32>
    %355 = vector.extract_strided_slice %342 {offsets = [0, 64], sizes = [8, 32], strides = [1, 1]} : vector<8x128xf32> to vector<8x32xf32>
    %356 = math.tanh %355 : vector<8x32xf32>
    %357 = vector.extract_strided_slice %342 {offsets = [0, 96], sizes = [8, 32], strides = [1, 1]} : vector<8x128xf32> to vector<8x32xf32>
    %358 = arith.negf %357 : vector<8x32xf32>
    %359 = math.exp %358 : vector<8x32xf32>
    %cst_104 = arith.constant 1.000000e+00 : f32
    %360 = vector.broadcast %cst_104 : f32 to vector<8x32xf32>
    %361 = arith.addf %360, %359 : vector<8x32xf32>
    %362 = arith.divf %360, %361 : vector<8x32xf32>
    %363 = arith.mulf %354, %331 : vector<8x32xf32>
    %364 = arith.mulf %348, %356 : vector<8x32xf32>
    %365 = arith.addf %363, %364 : vector<8x32xf32>
    %366 = math.tanh %365 : vector<8x32xf32>
    %367 = arith.mulf %362, %366 : vector<8x32xf32>
    %368 = arith.addi %11, %336 : i32
    %369 = vector.broadcast %368 : i32 to vector<8x1xi32>
    %370 = arith.cmpi slt, %369, %3 : vector<8x1xi32>
    %cst_105 = arith.constant 0.000000e+00 : f32
    %371 = vector.broadcast %cst_105 : f32 to vector<8x32xf32>
    %372 = vector.shape_cast %370 : vector<8x1xi1> to vector<8x1xi1>
    %373 = vector.broadcast %372 : vector<8x1xi1> to vector<8x32xi1>
    %374 = arith.select %373, %367, %371 : vector<8x32xi1>, vector<8x32xf32>
    %c0_106 = arith.constant 0 : index
    %375 = arith.index_cast %336 : i32 to index
    %c0_107 = arith.constant 0 : index
    %c0_108 = arith.constant 0 : index
    %376 = vector.load %arg5[%c0_106, %375, %c0_107, %c0_108] : memref<1x8x8x32xf32, #tpu.memory_space<vmem>>, vector<1x1x8x32xf32>
    %377 = vector.shape_cast %376 : vector<1x1x8x32xf32> to vector<8x32xf32>
    %378 = vector.shape_cast %374 : vector<8x32xf32> to vector<1x1x8x32xf32>
    tpu.vector_store %arg5[%c0_106, %375, %c0_107, %c0_108], %378 {strides = array<i32>} : memref<1x8x8x32xf32, #tpu.memory_space<vmem>>, vector<1x1x8x32xf32>,
    %379 = vector.shape_cast %370 : vector<8x1xi1> to vector<8x1xi1>
    %380 = vector.broadcast %379 : vector<8x1xi1> to vector<8x32xi1>
    %381 = arith.select %380, %367, %328 : vector<8x32xi1>, vector<8x32xf32>
    %382 = vector.shape_cast %370 : vector<8x1xi1> to vector<8x1xi1>
    %383 = vector.broadcast %382 : vector<8x1xi1> to vector<8x32xi1>
    %384 = arith.select %383, %365, %331 : vector<8x32xi1>, vector<8x32xf32>
    %c7_i32_109 = arith.constant 7 : i32
    %c7_i32_110 = arith.constant 7 : i32
    %385 = arith.muli %arg0, %c7_i32_110 : i32
    %c2_i32_111 = arith.constant 2 : i32
    %386 = arith.muli %c2_i32_111, %arg0 : i32
    %c1_i32_112 = arith.constant 1 : i32
    %387 = arith.subi %c1_i32_112, %386 : i32
    %388 = arith.muli %387, %c7_i32_109 : i32
    %389 = arith.addi %385, %388 : i32
    %c0_113 = arith.constant 0 : index
    %390 = arith.index_cast %389 : i32 to index
    %c0_114 = arith.constant 0 : index
    %c0_115 = arith.constant 0 : index
    %391 = vector.load %arg3[%c0_113, %390, %c0_114, %c0_115] : memref<1x8x8x128xf32, #tpu.memory_space<vmem>>, vector<1x1x8x128xf32>
    %392 = vector.shape_cast %391 : vector<1x1x8x128xf32> to vector<8x128xf32>
    %393 = arith.truncf %381 : vector<8x32xf32> to vector<8x32xbf16>
    %cst_116 = arith.constant dense<0.000000e+00> : vector<8x128xf32>
    %394 = tpu.matmul %393, %5, %cst_116 {dimension_numbers = #tpu.dot_dimension_numbers<[1], [0], [0], [1], [0, 0, 1, 1], [], []>} : vector<8x32xbf16>, vector<32x128xbf16>, vector<8x128xf32> -> vector<8x128xf32>
    %395 = arith.addf %392, %394 : vector<8x128xf32>
    %396 = vector.extract_strided_slice %395 {offsets = [0, 0], sizes = [8, 32], strides = [1, 1]} : vector<8x128xf32> to vector<8x32xf32>
    %397 = arith.negf %396 : vector<8x32xf32>
    %398 = math.exp %397 : vector<8x32xf32>
    %cst_117 = arith.constant 1.000000e+00 : f32
    %399 = vector.broadcast %cst_117 : f32 to vector<8x32xf32>
    %400 = arith.addf %399, %398 : vector<8x32xf32>
    %401 = arith.divf %399, %400 : vector<8x32xf32>
    %402 = vector.extract_strided_slice %395 {offsets = [0, 32], sizes = [8, 32], strides = [1, 1]} : vector<8x128xf32> to vector<8x32xf32>
    %403 = arith.negf %402 : vector<8x32xf32>
    %404 = math.exp %403 : vector<8x32xf32>
    %cst_118 = arith.constant 1.000000e+00 : f32
    %405 = vector.broadcast %cst_118 : f32 to vector<8x32xf32>
    %406 = arith.addf %405, %404 : vector<8x32xf32>
    %407 = arith.divf %405, %406 : vector<8x32xf32>
    %408 = vector.extract_strided_slice %395 {offsets = [0, 64], sizes = [8, 32], strides = [1, 1]} : vector<8x128xf32> to vector<8x32xf32>
    %409 = math.tanh %408 : vector<8x32xf32>
    %410 = vector.extract_strided_slice %395 {offsets = [0, 96], sizes = [8, 32], strides = [1, 1]} : vector<8x128xf32> to vector<8x32xf32>
    %411 = arith.negf %410 : vector<8x32xf32>
    %412 = math.exp %411 : vector<8x32xf32>
    %cst_119 = arith.constant 1.000000e+00 : f32
    %413 = vector.broadcast %cst_119 : f32 to vector<8x32xf32>
    %414 = arith.addf %413, %412 : vector<8x32xf32>
    %415 = arith.divf %413, %414 : vector<8x32xf32>
    %416 = arith.mulf %407, %384 : vector<8x32xf32>
    %417 = arith.mulf %401, %409 : vector<8x32xf32>
    %418 = arith.addf %416, %417 : vector<8x32xf32>
    %419 = math.tanh %418 : vector<8x32xf32>
    %420 = arith.mulf %415, %419 : vector<8x32xf32>
    %421 = arith.addi %11, %389 : i32
    %422 = vector.broadcast %421 : i32 to vector<8x1xi32>
    %423 = arith.cmpi slt, %422, %3 : vector<8x1xi32>
    %cst_120 = arith.constant 0.000000e+00 : f32
    %424 = vector.broadcast %cst_120 : f32 to vector<8x32xf32>
    %425 = vector.shape_cast %423 : vector<8x1xi1> to vector<8x1xi1>
    %426 = vector.broadcast %425 : vector<8x1xi1> to vector<8x32xi1>
    %427 = arith.select %426, %420, %424 : vector<8x32xi1>, vector<8x32xf32>
    %c0_121 = arith.constant 0 : index
    %428 = arith.index_cast %389 : i32 to index
    %c0_122 = arith.constant 0 : index
    %c0_123 = arith.constant 0 : index
    %429 = vector.load %arg5[%c0_121, %428, %c0_122, %c0_123] : memref<1x8x8x32xf32, #tpu.memory_space<vmem>>, vector<1x1x8x32xf32>
    %430 = vector.shape_cast %429 : vector<1x1x8x32xf32> to vector<8x32xf32>
    %431 = vector.shape_cast %427 : vector<8x32xf32> to vector<1x1x8x32xf32>
    tpu.vector_store %arg5[%c0_121, %428, %c0_122, %c0_123], %431 {strides = array<i32>} : memref<1x8x8x32xf32, #tpu.memory_space<vmem>>, vector<1x1x8x32xf32>,
    %432 = vector.shape_cast %423 : vector<8x1xi1> to vector<8x1xi1>
    %433 = vector.broadcast %432 : vector<8x1xi1> to vector<8x32xi1>
    %434 = arith.select %433, %420, %381 : vector<8x32xi1>, vector<8x32xf32>
    %435 = vector.shape_cast %423 : vector<8x1xi1> to vector<8x1xi1>
    %436 = vector.broadcast %435 : vector<8x1xi1> to vector<8x32xi1>
    %437 = arith.select %436, %418, %384 : vector<8x32xi1>, vector<8x32xf32>
    %c8_i32_124 = arith.constant 8 : i32
    %c0_125 = arith.constant 0 : index
    %c0_126 = arith.constant 0 : index
    %438 = vector.load %arg7[%c0_125, %c0_126] : memref<8x32xf32, #tpu.memory_space<vmem>>, vector<8x32xf32>
    tpu.vector_store %arg7[%c0_125, %c0_126], %434 {strides = array<i32>} : memref<8x32xf32, #tpu.memory_space<vmem>>, vector<8x32xf32>,
    %c0_127 = arith.constant 0 : index
    %c0_128 = arith.constant 0 : index
    %439 = vector.load %arg8[%c0_127, %c0_128] : memref<8x32xf32, #tpu.memory_space<vmem>>, vector<8x32xf32>
    tpu.vector_store %arg8[%c0_127, %c0_128], %437 {strides = array<i32>} : memref<8x32xf32, #tpu.memory_space<vmem>>, vector<8x32xf32>,
    %c0_129 = arith.constant 0 : index
    %c0_130 = arith.constant 0 : index
    %c0_131 = arith.constant 0 : index
    %440 = vector.load %arg6[%c0_129, %c0_130, %c0_131] : memref<1x8x32xf32, #tpu.memory_space<vmem>>, vector<1x8x32xf32>
    %441 = vector.shape_cast %440 : vector<1x8x32xf32> to vector<8x32xf32>
    %442 = vector.shape_cast %437 : vector<8x32xf32> to vector<1x8x32xf32>
    tpu.vector_store %arg6[%c0_129, %c0_130, %c0_131], %442 {strides = array<i32>} : memref<1x8x32xf32, #tpu.memory_space<vmem>>, vector<1x8x32xf32>,
    return
  }
  func.func @transform_0(%arg0: i32, %arg1: i32) -> (i32, i32) {
    %c0_i32 = arith.constant 0 : i32
    %c0_i32_0 = arith.constant 0 : i32
    %c0_i32_1 = arith.constant 0 : i32
    return %c0_i32, %c0_i32_0 : i32, i32
  }
  func.func @transform_1(%arg0: i32, %arg1: i32) -> (i32, i32, i32, i32) {
    %c0_i32 = arith.constant 0 : i32
    %0 = arith.muli %arg0, %c0_i32 : i32
    %c2_i32 = arith.constant 2 : i32
    %1 = arith.muli %c2_i32, %arg0 : i32
    %c1_i32 = arith.constant 1 : i32
    %2 = arith.subi %c1_i32, %1 : i32
    %3 = arith.muli %2, %arg1 : i32
    %4 = arith.addi %0, %3 : i32
    %c0_i32_0 = arith.constant 0 : i32
    %c0_i32_1 = arith.constant 0 : i32
    %c0_i32_2 = arith.constant 0 : i32
    return %arg0, %4, %c0_i32_0, %c0_i32_1 : i32, i32, i32, i32
  }
  func.func @transform_2(%arg0: i32, %arg1: i32) -> (i32, i32, i32) {
    %c0_i32 = arith.constant 0 : i32
    %c0_i32_0 = arith.constant 0 : i32
    %c0_i32_1 = arith.constant 0 : i32
    return %arg0, %c0_i32, %c0_i32_0 : i32, i32, i32
  }
  func.func @transform_3(%arg0: i32, %arg1: i32) -> (i32, i32, i32, i32) {
    %c0_i32 = arith.constant 0 : i32
    %0 = arith.muli %arg0, %c0_i32 : i32
    %c2_i32 = arith.constant 2 : i32
    %1 = arith.muli %c2_i32, %arg0 : i32
    %c1_i32 = arith.constant 1 : i32
    %2 = arith.subi %c1_i32, %1 : i32
    %3 = arith.muli %2, %arg1 : i32
    %4 = arith.addi %0, %3 : i32
    %c0_i32_0 = arith.constant 0 : i32
    %c0_i32_1 = arith.constant 0 : i32
    %c0_i32_2 = arith.constant 0 : i32
    return %arg0, %4, %c0_i32_0, %c0_i32_1 : i32, i32, i32, i32
  }
  func.func @transform_4(%arg0: i32, %arg1: i32) -> (i32, i32, i32) {
    %c0_i32 = arith.constant 0 : i32
    %c0_i32_0 = arith.constant 0 : i32
    %c0_i32_1 = arith.constant 0 : i32
    return %arg0, %c0_i32, %c0_i32_0 : i32, i32, i32
  }
}

module attributes {stable_mosaic.version = 11 : i64} {
  func.func @_kv_kernel(%arg0: i32, %arg1: memref<2x64x32xf32, #tpu.memory_space<vmem>>, %arg2: memref<32x32xbf16, #tpu.memory_space<vmem>>, %arg3: memref<32x32xbf16, #tpu.memory_space<vmem>>, %arg4: memref<1x32xf32, #tpu.memory_space<vmem>>, %arg5: memref<1x32xf32, #tpu.memory_space<vmem>>, %arg6: memref<64x32xf32, #tpu.memory_space<vmem>>, %arg7: memref<64x32xf32, #tpu.memory_space<vmem>>) attributes {dimension_semantics = [#tpu.dimension_semantics<parallel>], iteration_bounds = array<i64: 1>, scalar_prefetch = 0 : i64, scratch_operands = 0 : i64, tpu.core_type = #tpu.core_type<tc>, window_params = [{transform_indices = @transform_0, window_bounds = array<i64: 2, 64, 32>}, {pipeline_mode = #tpu.pipeline_mode<synchronous>, transform_indices = @transform_1, window_bounds = array<i64: 32, 32>}, {pipeline_mode = #tpu.pipeline_mode<synchronous>, transform_indices = @transform_2, window_bounds = array<i64: 32, 32>}, {pipeline_mode = #tpu.pipeline_mode<synchronous>, transform_indices = @transform_3, window_bounds = array<i64: 1, 32>}, {pipeline_mode = #tpu.pipeline_mode<synchronous>, transform_indices = @transform_4, window_bounds = array<i64: 1, 32>}, {transform_indices = @transform_5, window_bounds = array<i64: 64, 32>}, {transform_indices = @transform_6, window_bounds = array<i64: 64, 32>}]} {
    %c0 = arith.constant 0 : index
    %c0_0 = arith.constant 0 : index
    %c0_1 = arith.constant 0 : index
    %0 = vector.load %arg1[%c0, %c0_0, %c0_1] : memref<2x64x32xf32, #tpu.memory_space<vmem>>, vector<1x64x32xf32>
    %1 = vector.shape_cast %0 : vector<1x64x32xf32> to vector<64x32xf32>
    %c1 = arith.constant 1 : index
    %c0_2 = arith.constant 0 : index
    %c0_3 = arith.constant 0 : index
    %2 = vector.load %arg1[%c1, %c0_2, %c0_3] : memref<2x64x32xf32, #tpu.memory_space<vmem>>, vector<1x64x32xf32>
    %3 = vector.shape_cast %2 : vector<1x64x32xf32> to vector<64x32xf32>
    %4 = arith.addf %1, %3 : vector<64x32xf32>
    %cst = arith.constant 5.000000e-01 : f32
    %5 = vector.broadcast %cst : f32 to vector<64x32xf32>
    %6 = arith.mulf %5, %4 : vector<64x32xf32>
    %7 = arith.truncf %6 : vector<64x32xf32> to vector<64x32xbf16>
    %c0_4 = arith.constant 0 : index
    %c0_5 = arith.constant 0 : index
    %8 = vector.load %arg2[%c0_4, %c0_5] : memref<32x32xbf16, #tpu.memory_space<vmem>>, vector<32x32xbf16>
    %cst_6 = arith.constant dense<0.000000e+00> : vector<64x32xf32>
    %9 = tpu.matmul %7, %8, %cst_6 {dimension_numbers = #tpu.dot_dimension_numbers<[1], [0], [0], [1], [0, 0, 1, 1], [], []>} : vector<64x32xbf16>, vector<32x32xbf16>, vector<64x32xf32> -> vector<64x32xf32>
    %c0_7 = arith.constant 0 : index
    %c0_8 = arith.constant 0 : index
    %10 = vector.load %arg4[%c0_7, %c0_8] : memref<1x32xf32, #tpu.memory_space<vmem>>, vector<1x32xf32>
    %11 = vector.broadcast %10 : vector<1x32xf32> to vector<64x32xf32>
    %12 = arith.addf %9, %11 : vector<64x32xf32>
    %c0_9 = arith.constant 0 : index
    %c0_10 = arith.constant 0 : index
    %13 = vector.load %arg6[%c0_9, %c0_10] : memref<64x32xf32, #tpu.memory_space<vmem>>, vector<64x32xf32>
    tpu.vector_store %arg6[%c0_9, %c0_10], %12 {strides = array<i32>} : memref<64x32xf32, #tpu.memory_space<vmem>>, vector<64x32xf32>,
    %c0_11 = arith.constant 0 : index
    %c0_12 = arith.constant 0 : index
    %14 = vector.load %arg3[%c0_11, %c0_12] : memref<32x32xbf16, #tpu.memory_space<vmem>>, vector<32x32xbf16>
    %cst_13 = arith.constant dense<0.000000e+00> : vector<64x32xf32>
    %15 = tpu.matmul %7, %14, %cst_13 {dimension_numbers = #tpu.dot_dimension_numbers<[1], [0], [0], [1], [0, 0, 1, 1], [], []>} : vector<64x32xbf16>, vector<32x32xbf16>, vector<64x32xf32> -> vector<64x32xf32>
    %c0_14 = arith.constant 0 : index
    %c0_15 = arith.constant 0 : index
    %16 = vector.load %arg5[%c0_14, %c0_15] : memref<1x32xf32, #tpu.memory_space<vmem>>, vector<1x32xf32>
    %17 = vector.broadcast %16 : vector<1x32xf32> to vector<64x32xf32>
    %18 = arith.addf %15, %17 : vector<64x32xf32>
    %c0_16 = arith.constant 0 : index
    %c0_17 = arith.constant 0 : index
    %19 = vector.load %arg7[%c0_16, %c0_17] : memref<64x32xf32, #tpu.memory_space<vmem>>, vector<64x32xf32>
    tpu.vector_store %arg7[%c0_16, %c0_17], %18 {strides = array<i32>} : memref<64x32xf32, #tpu.memory_space<vmem>>, vector<64x32xf32>,
    return
  }
  func.func @transform_0(%arg0: i32) -> (i32, i32, i32) {
    %c0_i32 = arith.constant 0 : i32
    %c0_i32_0 = arith.constant 0 : i32
    %c0_i32_1 = arith.constant 0 : i32
    return %c0_i32, %arg0, %c0_i32_0 : i32, i32, i32
  }
  func.func @transform_1(%arg0: i32) -> (i32, i32) {
    %c0_i32 = arith.constant 0 : i32
    %c0_i32_0 = arith.constant 0 : i32
    %c0_i32_1 = arith.constant 0 : i32
    return %c0_i32, %c0_i32_0 : i32, i32
  }
  func.func @transform_2(%arg0: i32) -> (i32, i32) {
    %c0_i32 = arith.constant 0 : i32
    %c0_i32_0 = arith.constant 0 : i32
    %c0_i32_1 = arith.constant 0 : i32
    return %c0_i32, %c0_i32_0 : i32, i32
  }
  func.func @transform_3(%arg0: i32) -> (i32, i32) {
    %c0_i32 = arith.constant 0 : i32
    %c0_i32_0 = arith.constant 0 : i32
    %c0_i32_1 = arith.constant 0 : i32
    return %c0_i32, %c0_i32_0 : i32, i32
  }
  func.func @transform_4(%arg0: i32) -> (i32, i32) {
    %c0_i32 = arith.constant 0 : i32
    %c0_i32_0 = arith.constant 0 : i32
    %c0_i32_1 = arith.constant 0 : i32
    return %c0_i32, %c0_i32_0 : i32, i32
  }
  func.func @transform_5(%arg0: i32) -> (i32, i32) {
    %c0_i32 = arith.constant 0 : i32
    %c0_i32_0 = arith.constant 0 : i32
    return %arg0, %c0_i32 : i32, i32
  }
  func.func @transform_6(%arg0: i32) -> (i32, i32) {
    %c0_i32 = arith.constant 0 : i32
    %c0_i32_0 = arith.constant 0 : i32
    return %arg0, %c0_i32 : i32, i32
  }
}

</mosaic_0001>

<bundles_post_ra>
// kernel: encoder_forward.11
= control target key start
LH: loop header
LB: loop body
LE: loop exit
PB: predicated region body
PF: predicated region fallthrough
CT: control target
= control target key end

     0   :  { %v212_v0 = vmov 0.0   ;;  %vm213_vm0 = vmmov 0   ;;  %vm49_vm1 = vcmask 261120   ;;  %s294_s3 = inlined_call_operand.vmem [shape: bf16[32,32], index: 3, kind: input, shape index: {}]   ;;  %s295_s2 = inlined_call_operand.vmem [shape: bf16[32,32], index: 2, kind: input, shape index: {}]   ;;  %s296_s1 = inlined_call_operand.vmem [shape: f32[16,32], index: 1, kind: input, shape index: {}]   ;;  %s297_s0 = inlined_call_operand.vmem [shape: f32[16,32], index: 0, kind: input, shape index: {}]   ;;  %s298_s4 = inlined_call_operand.vmem [shape: f32[1,32], index: 4, kind: input, shape index: {}]   ;;  %s299_s5 = inlined_call_operand.vmem [shape: f32[16,32], index: 5, kind: output, shape index: {0}]   ;;  %s300_s6 = inlined_call_operand.vmem [shape: f32[16,32], index: 6, kind: output, shape index: {1}]  }
   0x1   :  { %186 = vmatprep.subr.bf16.mxu0 %v212_v0  ;;  %194 = vmatprep.subr.bf16.mxu1 %v212_v0  ;;  %v204_v1 = vld [vmem:[%s294_s3] sm:$0xff]   ;;  %v206_v3 = vld [vmem:[%s294_s3 + $0x8] sm:$0xff]  }
   0x2   :  { %v205_v2 = vld [vmem:[%s295_s2] sm:$0xff]   ;;  %190 = vmatprep.mubr.msk.bf16.mxu0 %vm213_vm0, %v212_v0  ;;  %198 = vmatprep.mubr.msk.bf16.mxu1 %vm213_vm0, %v212_v0  ;;  %v207_v4 = vld [vmem:[%s295_s2 + $0x8] sm:$0xff]  }
   0x3   :  { %187 = vmatpush3.bf16.msra.mxu0 %v204_v1  ;;  %195 = vmatpush3.bf16.msra.mxu1 %v205_v2  ;;  %v30_v5 = vld [vmem:[%s296_s1] sm:$0xff]  ;;  %v31_v6 = vld [vmem:[%s296_s1 + $0x8] sm:$0xff] }
   0x4   :  { %188 = vmatprep.subr.bf16.mxu0 %v212_v0  ;;  %196 = vmatprep.subr.bf16.mxu1 %v212_v0  ;;  %v23_v7 = vld [vmem:[%s297_s0] sm:$0xff]  ;;  %v32_v8 = vpack.c.bf16 %v31_v6, %v30_v5  ;;  %v24_v9 = vld [vmem:[%s297_s0 + $0x8] sm:$0xff] }
   0x5   :  { %v25_v10 = vpack.c.bf16 %v24_v9, %v23_v7  ;;  %v179_v13 = vld [vmem:[%s298_s4] ss:$0 sm:$0xff] }
   0x7   :  { %189 = vmatpush3.bf16.msra.mxu0 %v206_v3  ;;  %197 = vmatpush3.bf16.msra.mxu1 %v207_v4 }
   0xa   :  { %191 = vmatmul.mubr.msk.bf16.vlgmr.msra.gmra.mrb[0].mxu0 %vm49_vm1, %v32_v8  ;;  %199 = vmatmul.mubr.msk.bf16.vlgmr.msra.gmra.mrb[0].mxu1 %vm49_vm1, %v25_v10 }
  0xdd   :  { %v87_v11 = vpop.f32.mrb[0].mxu0  ;;  %v143_v12 = vpop.f32.mrb[0].mxu1 }
  0xde   :  { %v192_v14 = vpop.f32.mrb[1].mxu0  ;;  %v144_v15 = vadd.f32 %v143_v12, %v87_v11  ;;  %v200_v16 = vpop.f32.mrb[1].mxu1 }
  0xdf   :  { %v90_v17 = vpop.f32.mrb[2].mxu0  ;;  %v146_v18 = vpop.f32.mrb[2].mxu1 }
  0xe0   :  { %v193_v19 = vpop.f32.mrb[3].mxu0  ;;  %v157_v20 = vadd.f32 %v179_v13, %v144_v15  ;;  %v147_v21 = vadd.f32 %v146_v18, %v90_v17  ;;  %v201_v22 = vpop.f32.mrb[3].mxu1 }
  0xe2   :  { %159 = vst.msk [vmem:[%s299_s5] sm:$0xff] %vm49_vm1, %v157_v20  ;;  %208 = vtanh.f32 %v157_v20  ;;  %v158_v23 = vadd.f32 %v179_v13, %v147_v21 }
  0xe4   :  { %160 = vst.msk [vmem:[%s299_s5 + $0x8] sm:$0xff] %vm49_vm1, %v158_v23  ;;  %210 = vtanh.f32 %v158_v23 }
  0xec   :  { %v209_v24 = vpop.eup %208 }
  0xed   :  { %163 = vst.msk [vmem:[%s300_s6] sm:$0xff] %vm49_vm1, %v209_v24 }
  0xee   :  { %v211_v25 = vpop.eup %210 }
  0xef   :  { %164 = vst.msk [vmem:[%s300_s6 + $0x8] sm:$0xff] %vm49_vm1, %v211_v25 }

// kernel: encoder_forward.6
= control target key start
LH: loop header
LB: loop body
LE: loop exit
PB: predicated region body
PF: predicated region fallthrough
CT: control target
= control target key end

     0   :  { %vm56_vm0 = vcmask 261120   ;;  %s433_s1 = inlined_call_operand.vmem [shape: bf16[32,128], index: 1, kind: input, shape index: {}]   ;;  %s434_s2 = inlined_call_operand.vmem [shape: bf16[32,128], index: 2, kind: input, shape index: {}]   ;;  %s435_s0 = inlined_call_operand.vmem [shape: f32[64,32], index: 0, kind: input, shape index: {}]   ;;  %s436_s3 = inlined_call_operand.vmem [shape: f32[1,128], index: 3, kind: input, shape index: {}]   ;;  %s437_s4 = inlined_call_operand.vmem [shape: f32[1,128], index: 4, kind: input, shape index: {}]   ;;  %s438_s5 = inlined_call_operand.vmem [shape: f32[2,64,128], index: 5, kind: output, shape index: {}]  }
   0x1   :  { %v301_v0 = vld [vmem:[%s433_s1] sm:$0xff]   ;;  %v303_v2 = vld [vmem:[%s433_s1 + $0x8] sm:$0xff]   ;;  %v23_v6 = vld [vmem:[%s435_s0 + $0x10] sm:$0xff] }
   0x2   :  { %v302_v1 = vld [vmem:[%s434_s2] sm:$0xff]   ;;  %277 = vmatprep.subr.bf16.mxu0 %v301_v0  ;;  %v304_v3 = vld [vmem:[%s434_s2 + $0x8] sm:$0xff]   ;;  %v24_v8 = vld [vmem:[%s435_s0 + $0x18] sm:$0xff] }
   0x3   :  { %289 = vmatprep.subr.bf16.mxu1 %v302_v1  ;;  %278 = vmatpush3.bf16.msra.mxu0 %v301_v0  ;;  %v21_v4 = vld [vmem:[%s435_s0] sm:$0xff]  ;;  %v22_v5 = vld [vmem:[%s435_s0 + $0x8] sm:$0xff]  ;;  %v30_v11 = vpack.c.bf16 %v24_v8, %v23_v6  ;;  %v27_v13 = vld [vmem:[%s435_s0 + $0x30] sm:$0xff] }
   0x4   :  { %290 = vmatpush3.bf16.msra.mxu1 %v302_v1  ;;  %279 = vmatprep.subr.bf16.mxu0 %v303_v2  ;;  %v29_v7 = vpack.c.bf16 %v22_v5, %v21_v4  ;;  %v25_v9 = vld [vmem:[%s435_s0 + $0x20] sm:$0xff]  ;;  %v26_v10 = vld [vmem:[%s435_s0 + $0x28] sm:$0xff]  ;;  %v28_v14 = vld [vmem:[%s435_s0 + $0x38] sm:$0xff] }
   0x5   :  { %291 = vmatprep.subr.bf16.mxu1 %v304_v3  ;;  %v31_v12 = vpack.c.bf16 %v26_v10, %v25_v9  ;;  %v32_v15 = vpack.c.bf16 %v28_v14, %v27_v13  ;;  %v243_v16 = vld [vmem:[%s436_s3] ss:$0 sm:$0xff] }
   0x6   :  { %281 = vmatprep.mubr.msk.bf16.mxu0 %vm56_vm0, %v29_v7  ;;  %293 = vmatprep.mubr.msk.bf16.mxu1 %vm56_vm0, %v29_v7  ;;  %v250_v17 = vld [vmem:[%s437_s4] ss:$0 sm:$0xff] }
   0x7   :  { %280 = vmatpush3.bf16.msra.mxu0 %v303_v2 }
   0x8   :  { %292 = vmatpush3.bf16.msra.mxu1 %v304_v3 }
   0xa   :  { %282 = vmatmul.mubr.msk.bf16.vlgmr.msra.gmra.mrb[0].mxu0 %vm56_vm0, %v30_v11 }
   0xb   :  { %294 = vmatmul.mubr.msk.bf16.vlgmr.msra.gmra.mrb[0].mxu1 %vm56_vm0, %v30_v11  ;;  %285 = vmatprep.mubr.msk.bf16.mxu0 %vm56_vm0, %v31_v12 }
   0xc   :  { %297 = vmatprep.mubr.msk.bf16.mxu1 %vm56_vm0, %v31_v12 }
  0x12   :  { %286 = vmatmul.mubr.msk.bf16.gmra.mrb[4].mxu0 %vm56_vm0, %v32_v15 }
  0x13   :  { %298 = vmatmul.mubr.msk.bf16.gmra.mrb[4].mxu1 %vm56_vm0, %v32_v15 }
  0xdd   :  { %v283_v18 = vpop.f32.mrb[0].mxu0 }
  0xde   :  { %v112_v19 = vadd.f32 %v283_v18, %v243_v16  ;;  %v295_v20 = vpop.f32.mrb[0].mxu1  ;;  %v103_v21 = vpop.f32.mrb[1].mxu0 }
  0xdf   :  { %v208_v22 = vadd.f32 %v295_v20, %v250_v17  ;;  %v104_v23 = vadd.f32 %v243_v16, %v103_v21  ;;  %v199_v24 = vpop.f32.mrb[1].mxu1  ;;  %v284_v25 = vpop.f32.mrb[2].mxu0 }
  0xe0   :  { %136 = vst [vmem:[%s438_s5 + $0x10] sm:$0xff] %v112_v19  ;;  %v200_v26 = vadd.f32 %v250_v17, %v199_v24  ;;  %v115_v27 = vadd.f32 %v284_v25, %v243_v16  ;;  %v296_v28 = vpop.f32.mrb[2].mxu1  ;;  %v106_v29 = vpop.f32.mrb[3].mxu0 }
  0xe1   :  { %259 = vst [vmem:[%s438_s5 + $0x50] sm:$0xff] %v208_v22  ;;  %134 = vst [vmem:[%s438_s5] sm:$0xff] %v104_v23  ;;  %v211_v30 = vadd.f32 %v296_v28, %v250_v17  ;;  %v107_v31 = vadd.f32 %v243_v16, %v106_v29  ;;  %v202_v32 = vpop.f32.mrb[3].mxu1 }
  0xe2   :  { %257 = vst [vmem:[%s438_s5 + $0x40] sm:$0xff] %v200_v26  ;;  %137 = vst [vmem:[%s438_s5 + $0x18] sm:$0xff] %v115_v27  ;;  %v203_v33 = vadd.f32 %v250_v17, %v202_v32 }
  0xe3   :  { %260 = vst [vmem:[%s438_s5 + $0x58] sm:$0xff] %v211_v30  ;;  %135 = vst [vmem:[%s438_s5 + $0x8] sm:$0xff] %v107_v31 }
  0xe4   :  { %258 = vst [vmem:[%s438_s5 + $0x48] sm:$0xff] %v203_v33 }
  0xe5   :  { %v287_v34 = vpop.f32.mrb[4].mxu0 }
  0xe6   :  { %v128_v35 = vadd.f32 %v287_v34, %v243_v16  ;;  %v299_v36 = vpop.f32.mrb[4].mxu1  ;;  %v119_v37 = vpop.f32.mrb[5].mxu0 }
  0xe7   :  { %v224_v38 = vadd.f32 %v299_v36, %v250_v17  ;;  %v120_v39 = vadd.f32 %v243_v16, %v119_v37  ;;  %v215_v40 = vpop.f32.mrb[5].mxu1  ;;  %v288_v41 = vpop.f32.mrb[6].mxu0 }
  0xe8   :  { %140 = vst [vmem:[%s438_s5 + $0x30] sm:$0xff] %v128_v35  ;;  %v216_v42 = vadd.f32 %v250_v17, %v215_v40  ;;  %v131_v43 = vadd.f32 %v288_v41, %v243_v16  ;;  %v300_v44 = vpop.f32.mrb[6].mxu1  ;;  %v122_v45 = vpop.f32.mrb[7].mxu0 }
  0xe9   :  { %263 = vst [vmem:[%s438_s5 + $0x70] sm:$0xff] %v224_v38  ;;  %138 = vst [vmem:[%s438_s5 + $0x20] sm:$0xff] %v120_v39  ;;  %v227_v46 = vadd.f32 %v300_v44, %v250_v17  ;;  %v123_v47 = vadd.f32 %v243_v16, %v122_v45  ;;  %v218_v48 = vpop.f32.mrb[7].mxu1 }
  0xea   :  { %261 = vst [vmem:[%s438_s5 + $0x60] sm:$0xff] %v216_v42  ;;  %141 = vst [vmem:[%s438_s5 + $0x38] sm:$0xff] %v131_v43  ;;  %v219_v49 = vadd.f32 %v250_v17, %v218_v48 }
  0xeb   :  { %264 = vst [vmem:[%s438_s5 + $0x78] sm:$0xff] %v227_v46  ;;  %139 = vst [vmem:[%s438_s5 + $0x28] sm:$0xff] %v123_v47 }
  0xec   :  { %262 = vst [vmem:[%s438_s5 + $0x68] sm:$0xff] %v219_v49 }

// kernel: encoder_forward.8
= control target key start
LH: loop header
LB: loop body
LE: loop exit
PB: predicated region body
PF: predicated region fallthrough
CT: control target
= control target key end

     0   :  { %vm72_vm0 = vcmask 261120   ;;  %s772_s2 = inlined_call_operand.vmem [shape: bf16[32,128], index: 2, kind: input, shape index: {}]   ;;  %s773_s4 = inlined_call_operand.vmem [shape: bf16[32,128], index: 4, kind: input, shape index: {}]   ;;  %s774_s0 = inlined_call_operand.vmem [shape: f32[2,64,32], index: 0, kind: input, shape index: {}]   ;;  %s775_s1 = inlined_call_operand.vmem [shape: bf16[32,128], index: 1, kind: input, shape index: {}]   ;;  %s776_s3 = inlined_call_operand.vmem [shape: bf16[32,128], index: 3, kind: input, shape index: {}]   ;;  %s777_s5 = inlined_call_operand.vmem [shape: f32[1,128], index: 5, kind: input, shape index: {}]   ;;  %s778_s6 = inlined_call_operand.vmem [shape: f32[1,128], index: 6, kind: input, shape index: {}]   ;;  %s779_s7 = inlined_call_operand.vmem [shape: f32[2,64,128], index: 7, kind: output, shape index: {}]  }
   0x1   :  { %v582_v0 = vld [vmem:[%s772_s2] sm:$0xff]   ;;  %v584_v2 = vld [vmem:[%s772_s2 + $0x8] sm:$0xff]   ;;  %v454_v6 = vld [vmem:[%s774_s0 + $0x50] sm:$0xff] }
   0x2   :  { %v583_v1 = vld [vmem:[%s773_s4] sm:$0xff]   ;;  %518 = vmatprep.subr.bf16.mxu0 %v582_v0  ;;  %v585_v3 = vld [vmem:[%s773_s4 + $0x8] sm:$0xff]   ;;  %v455_v8 = vld [vmem:[%s774_s0 + $0x58] sm:$0xff] }
   0x3   :  { %542 = vmatprep.subr.bf16.mxu1 %v583_v1  ;;  %519 = vmatpush3.bf16.msra.mxu0 %v582_v0  ;;  %v452_v4 = vld [vmem:[%s774_s0 + $0x40] sm:$0xff]  ;;  %v453_v5 = vld [vmem:[%s774_s0 + $0x48] sm:$0xff]  ;;  %v49_v9 = vpack.c.bf16 %v455_v8, %v454_v6  ;;  %v458_v17 = vld [vmem:[%s774_s0 + $0x70] sm:$0xff] }
   0x4   :  { %543 = vmatpush3.bf16.msra.mxu1 %v583_v1  ;;  %520 = vmatprep.subr.bf16.mxu0 %v584_v2  ;;  %v48_v7 = vpack.c.bf16 %v453_v5, %v452_v4  ;;  %v586_v10 = vld [vmem:[%s775_s1] sm:$0xff]   ;;  %v457_v13 = vld [vmem:[%s774_s0 + $0x68] sm:$0xff]  ;;  %v459_v18 = vld [vmem:[%s774_s0 + $0x78] sm:$0xff] }
   0x5   :  { %544 = vmatprep.subr.bf16.mxu1 %v585_v3  ;;  %v587_v11 = vld [vmem:[%s776_s3] sm:$0xff]   ;;  %v588_v15 = vld [vmem:[%s775_s1 + $0x8] sm:$0xff]   ;;  %v51_v21 = vpack.c.bf16 %v459_v18, %v458_v17  ;;  %v29_v23 = vld [vmem:[%s774_s0 + $0x10] sm:$0xff] }
   0x6   :  { %522 = vmatprep.mubr.msk.bf16.mxu0 %vm72_vm0, %v48_v7  ;;  %v456_v12 = vld [vmem:[%s774_s0 + $0x60] sm:$0xff]  ;;  %546 = vmatprep.mubr.msk.bf16.mxu1 %vm72_vm0, %v48_v7  ;;  %v589_v16 = vld [vmem:[%s776_s3 + $0x8] sm:$0xff]   ;;  %v30_v24 = vld [vmem:[%s774_s0 + $0x18] sm:$0xff] }
   0x7   :  { %521 = vmatpush3.bf16.msra.mxu0 %v584_v2  ;;  %v50_v14 = vpack.c.bf16 %v457_v13, %v456_v12  ;;  %v27_v19 = vld [vmem:[%s774_s0] sm:$0xff]  ;;  %v28_v20 = vld [vmem:[%s774_s0 + $0x8] sm:$0xff]  ;;  %v36_v27 = vpack.c.bf16 %v30_v24, %v29_v23  ;;  %v33_v29 = vld [vmem:[%s774_s0 + $0x30] sm:$0xff] }
   0x8   :  { %545 = vmatpush3.bf16.msra.mxu1 %v585_v3  ;;  %530 = vmatprep.subr.bf16.mxu0 %v586_v10  ;;  %v35_v22 = vpack.c.bf16 %v28_v20, %v27_v19  ;;  %v31_v25 = vld [vmem:[%s774_s0 + $0x20] sm:$0xff]  ;;  %v32_v26 = vld [vmem:[%s774_s0 + $0x28] sm:$0xff]  ;;  %v34_v30 = vld [vmem:[%s774_s0 + $0x38] sm:$0xff] }
   0x9   :  { %554 = vmatprep.subr.bf16.mxu1 %v587_v11  ;;  %v37_v28 = vpack.c.bf16 %v32_v26, %v31_v25  ;;  %v38_v31 = vpack.c.bf16 %v34_v30, %v33_v29  ;;  %v472_v32 = vld [vmem:[%s777_s5] ss:$0 sm:$0xff] }
   0xa   :  { %523 = vmatmul.mubr.msk.bf16.vlgmr.msra.gmra.mrb[0].mxu0 %vm72_vm0, %v49_v9  ;;  %v485_v33 = vld [vmem:[%s778_s6] ss:$0 sm:$0xff] }
   0xb   :  { %547 = vmatmul.mubr.msk.bf16.vlgmr.msra.gmra.mrb[0].mxu1 %vm72_vm0, %v49_v9  ;;  %531 = vmatpush3.bf16.msra.mxu0 %v586_v10 }
   0xc   :  { %555 = vmatpush3.bf16.msra.mxu1 %v587_v11  ;;  %526 = vmatprep.mubr.msk.bf16.mxu0 %vm72_vm0, %v50_v14 }
   0xd   :  { %550 = vmatprep.mubr.msk.bf16.mxu1 %vm72_vm0, %v50_v14  ;;  %532 = vmatprep.subr.bf16.mxu0 %v588_v15 }
   0xe   :  { %556 = vmatprep.subr.bf16.mxu1 %v589_v16 }
   0xf   :  { %533 = vmatpush3.bf16.msra.mxu0 %v588_v15 }
  0x10   :  { %557 = vmatpush3.bf16.msra.mxu1 %v589_v16 }
  0x12   :  { %527 = vmatmul.mubr.msk.bf16.gmra.mrb[4].mxu0 %vm72_vm0, %v51_v21 }
  0x13   :  { %551 = vmatmul.mubr.msk.bf16.gmra.mrb[4].mxu1 %vm72_vm0, %v51_v21  ;;  %534 = vmatprep.mubr.msk.bf16.mxu0 %vm72_vm0, %v35_v22 }
  0x14   :  { %558 = vmatprep.mubr.msk.bf16.mxu1 %vm72_vm0, %v35_v22 }
  0x1a   :  { %535 = vmatmul.mubr.msk.bf16.vlgmr.msra.gmra.mrb[0].mxu0 %vm72_vm0, %v36_v27 }
  0x1b   :  { %559 = vmatmul.mubr.msk.bf16.vlgmr.msra.gmra.mrb[0].mxu1 %vm72_vm0, %v36_v27  ;;  %538 = vmatprep.mubr.msk.bf16.mxu0 %vm72_vm0, %v37_v28 }
  0x1c   :  { %562 = vmatprep.mubr.msk.bf16.mxu1 %vm72_vm0, %v37_v28 }
  0x22   :  { %539 = vmatmul.mubr.msk.bf16.gmra.mrb[4].mxu0 %vm72_vm0, %v38_v31 }
  0x23   :  { %563 = vmatmul.mubr.msk.bf16.gmra.mrb[4].mxu1 %vm72_vm0, %v38_v31 }
  0xed   :  { %v536_v34 = vpop.f32.mrb[0].mxu0 }
  0xee   :  { %v248_v35 = vadd.f32 %v536_v34, %v472_v32  ;;  %v560_v36 = vpop.f32.mrb[0].mxu1  ;;  %v208_v37 = vpop.f32.mrb[1].mxu0 }
  0xef   :  { %v433_v38 = vadd.f32 %v560_v36, %v485_v33  ;;  %v246_v39 = vadd.f32 %v472_v32, %v208_v37  ;;  %v393_v40 = vpop.f32.mrb[1].mxu1  ;;  %v537_v41 = vpop.f32.mrb[2].mxu0 }
  0xf0   :  { %256 = vst [vmem:[%s779_s7 + $0x10] sm:$0xff] %v248_v35  ;;  %v431_v42 = vadd.f32 %v485_v33, %v393_v40  ;;  %v249_v43 = vadd.f32 %v537_v41, %v472_v32  ;;  %v561_v44 = vpop.f32.mrb[2].mxu1  ;;  %v211_v45 = vpop.f32.mrb[3].mxu0 }
  0xf1   :  { %488 = vst [vmem:[%s779_s7 + $0x50] sm:$0xff] %v433_v38  ;;  %254 = vst [vmem:[%s779_s7] sm:$0xff] %v246_v39  ;;  %v434_v46 = vadd.f32 %v561_v44, %v485_v33  ;;  %v247_v47 = vadd.f32 %v472_v32, %v211_v45  ;;  %v396_v48 = vpop.f32.mrb[3].mxu1 }
  0xf2   :  { %486 = vst [vmem:[%s779_s7 + $0x40] sm:$0xff] %v431_v42  ;;  %257 = vst [vmem:[%s779_s7 + $0x18] sm:$0xff] %v249_v43  ;;  %v432_v49 = vadd.f32 %v485_v33, %v396_v48 }
  0xf3   :  { %489 = vst [vmem:[%s779_s7 + $0x58] sm:$0xff] %v434_v46  ;;  %255 = vst [vmem:[%s779_s7 + $0x8] sm:$0xff] %v247_v47 }
  0xf4   :  { %487 = vst [vmem:[%s779_s7 + $0x48] sm:$0xff] %v432_v49 }
  0xf5   :  { %v540_v50 = vpop.f32.mrb[4].mxu0 }
  0xf6   :  { %v252_v51 = vadd.f32 %v540_v50, %v472_v32  ;;  %v564_v52 = vpop.f32.mrb[4].mxu1  ;;  %v224_v53 = vpop.f32.mrb[5].mxu0 }
  0xf7   :  { %v437_v54 = vadd.f32 %v564_v52, %v485_v33  ;;  %v250_v55 = vadd.f32 %v472_v32, %v224_v53  ;;  %v409_v56 = vpop.f32.mrb[5].mxu1  ;;  %v541_v57 = vpop.f32.mrb[6].mxu0 }
  0xf8   :  { %260 = vst [vmem:[%s779_s7 + $0x30] sm:$0xff] %v252_v51  ;;  %v435_v58 = vadd.f32 %v485_v33, %v409_v56  ;;  %v253_v59 = vadd.f32 %v541_v57, %v472_v32  ;;  %v565_v60 = vpop.f32.mrb[6].mxu1  ;;  %v227_v61 = vpop.f32.mrb[7].mxu0 }
  0xf9   :  { %492 = vst [vmem:[%s779_s7 + $0x70] sm:$0xff] %v437_v54  ;;  %258 = vst [vmem:[%s779_s7 + $0x20] sm:$0xff] %v250_v55  ;;  %v438_v62 = vadd.f32 %v565_v60, %v485_v33  ;;  %v251_v63 = vadd.f32 %v472_v32, %v227_v61  ;;  %v412_v0 = vpop.f32.mrb[7].mxu1 }
  0xfa   :  { %490 = vst [vmem:[%s779_s7 + $0x60] sm:$0xff] %v435_v58  ;;  %261 = vst [vmem:[%s779_s7 + $0x38] sm:$0xff] %v253_v59  ;;  %v436_v1 = vadd.f32 %v485_v33, %v412_v0 }
  0xfb   :  { %493 = vst [vmem:[%s779_s7 + $0x78] sm:$0xff] %v438_v62  ;;  %259 = vst [vmem:[%s779_s7 + $0x28] sm:$0xff] %v251_v63 }
  0xfc   :  { %491 = vst [vmem:[%s779_s7 + $0x68] sm:$0xff] %v436_v1 }

// kernel: encoder_forward.7
= control target key start
LH: loop header
LB: loop body
LE: loop exit
PB: predicated region body
PF: predicated region fallthrough
CT: control target
= control target key end

     0   :  { %s1606_s15 = smov 0   ;;  %s1608_s16 = smov 0   ;;  %s1990_s0 = inlined_call_operand.vmem [shape: s32[8,1], index: 0, kind: input, shape index: {}]   ;;  %s1991_s1 = inlined_call_operand.vmem [shape: f32[2,8,8,128], index: 1, kind: input, shape index: {}]   ;;  %s1992_s2 = inlined_call_operand.vmem [shape: bf16[2,32,128], index: 2, kind: input, shape index: {}]   ;;  %s1993_s3 = inlined_call_operand.vmem [shape: f32[2,8,8,32], index: 3, kind: output, shape index: {0}]   ;;  %s1994_s4 = inlined_call_operand.vmem [shape: f32[2,8,32], index: 4, kind: output, shape index: {1}]  }
   0x1   :  { %s1610_s17 = smov 0  }
   0x2 LB: > { %s27_s18 = sadd.s32 1, %s1569_s16  ;;  %p1321_p0 = scmp.ge.s32.totalorder %s1573_s17, 1  ;;  %s1573_s17 = sphi %s1610_s17, %s15_s17   ;;  %s1569_s16 = sphi %s1608_s16, %s2002_s16   ;;  %s1565_s15 = sphi %s1606_s15, %s2001_s15  }
   0x3   : > { %p29_p1 = scmp.ge.s32.totalorder %s27_s18, 2  ;;  %p214_p2 = scmp.lt.s32.totalorder %s1573_s17, 3 }
   0x5   : > { %s2004_s18 = smov (%p29_p1, %s27_s18), 0  ;;  %p215_p3 = pnand %p1321_p0, %p214_p2 }
   0x6   : > { %p267_p4 = scmp.lt.s32.totalorder (!%p215_p3), %s1565_s15, 1  ;;  %vm309_vm0 = vcmask (!%p215_p3), 261120   ;;  %v1575_v0 = vmov (!%p215_p3), 0.0   ;;  %vm1576_vm1 = vmmov (!%p215_p3), 0   ;;  %s1332_s25 = smul.u32 (!%p215_p3), 56, %s1565_s15  ;;  %v1577_v11 = vmov (!%p215_p3), 0  }
   0x7   : > { %218 = sbr.rel (%p215_p3) target bundleno = 5669 (0x1625), region = 32  ;;  %1389 = vmatprep.subr.bf16.mxu0 (!%p215_p3), %v1575_v0  ;;  %1393 = vmatprep.mubr.msk.bf16.mxu0 (!%p215_p3), %vm1576_vm1, %v1575_v0  ;;  %310 = vst.msk [vmem:[#allocation2] sm:$0xff] (!%p215_p3), %vm309_vm0, %v1575_v0  ;;  %311 = vst.msk [vmem:[#allocation3] sm:$0xff] (!%p215_p3), %vm309_vm0, %v1575_v0  ;;  %s1578_s30 = smov (!%p215_p3), 64   ;;  %v1685_v17 = vld [vmem:[%s1990_s0] sm:$0xff] (!%p215_p3) }
   0x8   : > { %1397 = vmatprep.subr.bf16.mxu1 (!%p215_p3), %v1575_v0  ;;  %1401 = vmatprep.mubr.msk.bf16.mxu1 (!%p215_p3), %vm1576_vm1, %v1575_v0  ;;  %s1579_s5 = smov (!%p215_p3), 32   ;;  %s1680_s6 = smul.u32 (!%p215_p3), 7, %s1565_s15 }
   0x9   : > { %1483 = vset.pattern.permute.xlu1 (!%p215_p3), %v1577_v11  ;;  %1484 = vset.pattern.permute.xlu0 (!%p215_p3), %v1577_v11  ;;  %s1997_s9 = smov (!%p215_p3), 96   ;;  %s1331_s10 = sshll.u32 (!%p215_p3), %s1565_s15, 1 }
   0xa   : > { %v414_v18 = vstv (!%p215_p3), %s1680_s6  ;;  %s1710_s11 = ssub.s32 (!%p215_p3), 1, %s1331_s10 }
   0xb   : > { %vm415_vm2 = vcmp.lt.s32.totalorder (!%p215_p3), %v414_v18, %v1685_v17  ;;  %s1714_s12 = sadd.s32 (!%p215_p3), %s1680_s6, %s1710_s11  ;;  %s621_s26 = smul.u32 (!%p215_p3), 3, %s1710_s11 }
   0xc   : > { %v416_v22 = vsel (!%p215_p3), %vm415_vm2, 1, %v1577_v11  ;;  %s1337_s13 = sshll.u32 (!%p215_p3), %s1714_s12, 3  ;;  %v511_v41 = vstv (!%p215_p3), %s1714_s12  ;;  %s1347_s8 = sshll.u32 (!%p215_p3), %s1710_s11, 2 }
   0xd   : > { %vm512_vm4 = vcmp.lt.s32.totalorder (!%p215_p3), %v511_v41, %v1685_v17  ;;  %s1778_s27 = sadd.s32 (!%p215_p3), %s621_s26, %s1680_s6  ;;  %s1809_s10 = sadd.s32 (!%p215_p3), %s1347_s8, %s1680_s6 }
   0xe   : > { %s1635_s19 = scalar_select %p267_p4, %s1565_s15, 1  ;;  %v321_v3 = vld [vmem:[#allocation2] sm:$0xff]  ;;  %v322_v13 = vld [vmem:[#allocation3] sm:$0xff]  ;;  %v513_v43 = vsel %vm512_vm4, 1, %v1577_v11 }
   0xf   : > { %v327_v4 = vpack.c.bf16 %v321_v3, %v321_v3  ;;  %s1998_s12 = smov 96  }
  0x10   : > { %s1363_s20 = sshll.u32 %s1635_s19, 4  ;;  %s1362_s24 = sshll.u32 %s1635_s19, 6 }
  0x11   : > { %s283_s23 = scalar_lea.vmem %s1992_s2, %s1363_s20  ;;  %s1670_s28 = scalar_lea.vmem %s1991_s1, %s1362_s24 }
  0x12   : > { %v1644_v1 = vld [vmem:[%s283_s23] sm:$0xff]   ;;  %v1647_v2 = vld [vmem:[%s283_s23 + $0x8] sm:$0xff]   ;;  %s325_s29 = scalar_lea.vmem %s1670_s28, %s1332_s25  ;;  %s436_s14 = scalar_lea.vmem %s1670_s28, %s1337_s13 }
  0x13   : > { %1390 = vmatpush3.bf16.msra.mxu0 %v1644_v1  ;;  %1398 = vmatpush3.bf16.msra.mxu1 %v1644_v1  ;;  %v326_v5 = vld [vmem:[%s325_s29] sm:$0xff]  ;;  %s1340_s20 = sshll.u32 %s1710_s11, 1  ;;  %s1344_s29 = sshll.u32 %s1778_s27, 3 }
  0x14   : > { %1391 = vmatprep.subr.bf16.mxu0 %v1575_v0  ;;  %1399 = vmatprep.subr.bf16.mxu1 %v1575_v0  ;;  %v437_v35 = vld [vmem:[%s436_s14] sm:$0xff]  ;;  %s1746_s21 = sadd.s32 %s1340_s20, %s1680_s6  ;;  %s624_s7 = scalar_lea.vmem %s1670_s28, %s1344_s29 }
  0x15   : > { %s1341_s22 = sshll.u32 %s1746_s21, 3  ;;  %s1348_s14 = sshll.u32 %s1809_s10, 3 }
  0x16   : > { %s530_s23 = scalar_lea.vmem %s1670_s28, %s1341_s22  ;;  %s718_s20 = scalar_lea.vmem %s1670_s28, %s1348_s14 }
  0x17   : > { %1392 = vmatpush3.bf16.msra.mxu0 %v1647_v2  ;;  %1400 = vmatpush3.bf16.msra.mxu1 %v1647_v2  ;;  %v531_v61 = vld [vmem:[%s530_s23] sm:$0xff]  ;;  %s809_s23 = smul.u32 5, %s1710_s11 }
  0x18   : > { %1405 = vmatprep.subr.bf16.mxu0 %v1575_v0  ;;  %1413 = vmatprep.subr.bf16.mxu1 %v1575_v0 }
  0x19   : > { %s1840_s26 = sadd.s32 %s809_s23, %s1680_s6 }
  0x1a   : > { %1394 = vmatmul.mubr.msk.bf16.vlgmr.msra.gmra.mrb[0].mxu0 %vm309_vm0, %v327_v4 }
  0x1b   : > { %1406 = vmatpush3.bf16.msra.mxu0 %v1644_v1  ;;  %1409 = vmatprep.mubr.msk.bf16.mxu0 %vm1576_vm1, %v1575_v0 }
  0x1c   : > { %1407 = vmatprep.subr.bf16.mxu0 %v1575_v0 }
  0x1f   : > { %1408 = vmatpush3.bf16.msra.mxu0 %v1647_v2 }
  0x20   : > { %1421 = vmatprep.subr.bf16.mxu0 %v1575_v0 }
  0xed   : > { %v378_v6 = vpop.f32.mrb[0].mxu0 }
  0xee   : > { %v384_v7 = vadd.f32 %v378_v6, %v326_v5  ;;  %v1395_v8 = vpop.f32.mrb[1].mxu0  ;;  %v605_v6 = vstv %s1746_s21 }
  0xef   : > { %v381_v9 = vpop.f32.mrb[2].mxu0  ;;  %vm606_vm6 = vcmp.lt.s32.totalorder %v605_v6, %v1685_v17 }
  0xf0   : > { %1487 = vtanh.f32 %v384_v7  ;;  %v1396_v10 = vpop.f32.mrb[3].mxu0  ;;  %v1336_v14 = vmul.f32 -1.442695, %v384_v7  ;;  %v607_v8 = vsel %vm606_vm6, 1, %v1577_v11 }
  0xf2   : > { %1489 = vpow2.f32 %v1336_v14 }
  0xfa   : > { %v1488_v12 = vpop.eup %1487 }
  0xfb   : > { %398 = vrot.lane.b32.xlu0 %v1488_v12, %s1578_s30 }
  0xfc   : > { %v1490_v15 = vpop.eup %1489 }
  0xfd   : > { %v388_v16 = vadd.f32 1.0, %v1490_v15 }
  0xff   : > { %393 = vrot.lane.b32.xlu0 %v322_v13, %s1579_s5  ;;  %1491 = vrcp.f32 %v388_v16 }
 0x109   : > { %v1492_v19 = vpop.eup %1491 }
 0x16d   : > { %v399_v20 = vpop.permute.xlu0 %398 }
 0x16e   : > { %v401_v21 = vmul.f32 %v1492_v19, %v399_v20 }
 0x170   : > { %403 = vrot.lane.b32.xlu1 %v401_v21, %s1579_s5 }
 0x171   : > { %v394_v23 = vpop.permute.xlu0 %393 }
 0x172   : > { %v396_v24 = vmul.f32 %v1492_v19, %v394_v23 }
 0x174   : > { %418 = vperm.xlu1 %1483, %v416_v22  }
 0x178   : > { %429 = vrot.lane.b32.xlu1 %v321_v3, %s1997_s9 }
 0x1e2   : > { %v404_v25 = vpop.permute.xlu1 %403 }
 0x1e3   : > { %v406_v26 = vadd.f32 %v404_v25, %v396_v24 }
 0x1e5   : > { %1493 = vtanh.f32 %v406_v26 }
 0x1ef   : > { %v1494_v27 = vpop.eup %1493 }
 0x1f0   : > { %409 = vrot.lane.b32.xlu0 %v1494_v27, %s1578_s30 }
 0x1f3   : > { %v1693_v28 = vpop.permute.xlu1 %418 }
 0x1f4   : > { %vm420_vm3 = vcmp.eq.s32.totalorder %v1693_v28, 1 }
 0x1f5   : > { %v433_v50 = vsel %vm420_vm3, %v406_v26, %v394_v23 }
 0x1f7   : > { %v430_v30 = vpop.permute.xlu1 %429 }
 0x262   : > { %v410_v29 = vpop.permute.xlu0 %409 }
 0x263   : > { %v1695_v31 = vmul.f32 %v1492_v19, %v410_v29  ;;  %v625_v29 = vld [vmem:[%s624_s7] sm:$0xff]  ;;  %s1995_s7 = sshll.u32 %s1840_s26, 3 }
 0x264   : > { %s812_s8 = scalar_lea.vmem %s1670_s28, %s1995_s7 }
 0x265   : > { %v432_v32 = vsel %vm420_vm3, %v1695_v31, %v430_v30 }
 0x266   : > { %v438_v33 = vpack.c.bf16 %v432_v32, %v432_v32 }
 0x268   : > { %440 = vrot.lane.b32.xlu0 %v438_v33, %s1579_s5 }
 0x2da   : > { %v441_v34 = vpop.permute.xlu0 %440 }
 0x2db   : > { %1402 = vmatmul.mubr.msk.bf16.vlgmr.msra.gmra.mrb[0].mxu1 %vm309_vm0, %v441_v34 }
 0x2dc   : > { %1414 = vmatpush3.bf16.msra.mxu1 %v1644_v1  ;;  %1417 = vmatprep.mubr.msk.bf16.mxu1 %vm1576_vm1, %v1575_v0 }
 0x2dd   : > { %1415 = vmatprep.subr.bf16.mxu1 %v1575_v0 }
 0x2e0   : > { %1416 = vmatpush3.bf16.msra.mxu1 %v1647_v2 }
 0x2e1   : > { %1429 = vmatprep.subr.bf16.mxu1 %v1575_v0 }
 0x3ae   : > { %v479_v36 = vpop.f32.mrb[0].mxu1 }
 0x3af   : > { %v485_v37 = vadd.f32 %v479_v36, %v437_v35  ;;  %v1403_v38 = vpop.f32.mrb[1].mxu1  ;;  %v699_v36 = vstv %s1778_s27 }
 0x3b0   : > { %v482_v39 = vpop.f32.mrb[2].mxu1  ;;  %vm700_vm8 = vcmp.lt.s32.totalorder %v699_v36, %v1685_v17 }
 0x3b1   : > { %1495 = vtanh.f32 %v485_v37  ;;  %v1404_v40 = vpop.f32.mrb[3].mxu1  ;;  %v1339_v44 = vmul.f32 -1.442695, %v485_v37  ;;  %v701_v38 = vsel %vm700_vm8, 1, %v1577_v11 }
 0x3b3   : > { %1497 = vpow2.f32 %v1339_v44 }
 0x3bb   : > { %v1496_v42 = vpop.eup %1495 }
 0x3bc   : > { %495 = vrot.lane.b32.xlu1 %v1496_v42, %s1578_s30 }
 0x3bd   : > { %v1498_v45 = vpop.eup %1497 }
 0x3be   : > { %v489_v46 = vadd.f32 1.0, %v1498_v45 }
 0x3c0   : > { %515 = vperm.xlu1 %1483, %v513_v43   ;;  %1499 = vrcp.f32 %v489_v46 }
 0x3ca   : > { %v1500_v47 = vpop.eup %1499 }
 0x3cb   : > { %v493_v51 = vmul.f32 %v1500_v47, %v433_v50 }
 0x42e   : > { %v496_v48 = vpop.permute.xlu1 %495 }
 0x42f   : > { %v498_v49 = vmul.f32 %v1500_v47, %v496_v48 }
 0x431   : > { %500 = vrot.lane.b32.xlu0 %v498_v49, %s1579_s5 }
 0x43f   : > { %v1728_v55 = vpop.permute.xlu1 %515 }
 0x440   : > { %vm517_vm5 = vcmp.eq.s32.totalorder %v1728_v55, 1 }
 0x4a3   : > { %v501_v52 = vpop.permute.xlu0 %500 }
 0x4a4   : > { %v503_v53 = vadd.f32 %v501_v52, %v493_v51 }
 0x4a6   : > { %1501 = vtanh.f32 %v503_v53  ;;  %v526_v16 = vsel %vm517_vm5, %v503_v53, %v433_v50 }
 0x4b0   : > { %v1502_v54 = vpop.eup %1501 }
 0x4b1   : > { %506 = vrot.lane.b32.xlu0 %v1502_v54, %s1578_s30 }
 0x523   : > { %v507_v56 = vpop.permute.xlu0 %506 }
 0x524   : > { %v1730_v57 = vmul.f32 %v1500_v47, %v507_v56 }
 0x526   : > { %v525_v58 = vsel %vm517_vm5, %v1730_v57, %v432_v32 }
 0x527   : > { %v532_v59 = vpack.c.bf16 %v525_v58, %v525_v58 }
 0x529   : > { %534 = vrot.lane.b32.xlu1 %v532_v59, %s1579_s5 }
 0x59b   : > { %v535_v60 = vpop.permute.xlu1 %534 }
 0x59c   : > { %1410 = vmatmul.mubr.msk.bf16.vlgmr.msra.gmra.mrb[4].mxu0 %vm309_vm0, %v535_v60 }
 0x59d   : > { %1422 = vmatpush3.bf16.msra.mxu0 %v1644_v1  ;;  %1425 = vmatprep.mubr.msk.bf16.mxu0 %vm1576_vm1, %v1575_v0 }
 0x59e   : > { %1423 = vmatprep.subr.bf16.mxu0 %v1575_v0 }
 0x5a1   : > { %1424 = vmatpush3.bf16.msra.mxu0 %v1647_v2 }
 0x5a2   : > { %1437 = vmatprep.subr.bf16.mxu0 %v1575_v0 }
 0x66f   : > { %v573_v62 = vpop.f32.mrb[4].mxu0 }
 0x670   : > { %v579_v63 = vadd.f32 %v573_v62, %v531_v61  ;;  %v1411_v3 = vpop.f32.mrb[5].mxu0 }
 0x671   : > { %v576_v4 = vpop.f32.mrb[6].mxu0  ;;  %v793_v3 = vstv %s1809_s10 }
 0x672   : > { %1503 = vtanh.f32 %v579_v63  ;;  %v1412_v5 = vpop.f32.mrb[7].mxu0  ;;  %v1343_v9 = vmul.f32 -1.442695, %v579_v63  ;;  %vm794_vm10 = vcmp.lt.s32.totalorder %v793_v3, %v1685_v17 }
 0x673   : > { %v795_v5 = vsel %vm794_vm10, 1, %v1577_v11 }
 0x674   : > { %1505 = vpow2.f32 %v1343_v9 }
 0x67c   : > { %v1504_v7 = vpop.eup %1503 }
 0x67d   : > { %589 = vrot.lane.b32.xlu0 %v1504_v7, %s1578_s30 }
 0x67e   : > { %v1506_v10 = vpop.eup %1505 }
 0x67f   : > { %v583_v12 = vadd.f32 1.0, %v1506_v10 }
 0x681   : > { %609 = vperm.xlu0 %1484, %v607_v8   ;;  %1507 = vrcp.f32 %v583_v12 }
 0x68b   : > { %v1508_v13 = vpop.eup %1507 }
 0x68c   : > { %v587_v18 = vmul.f32 %v1508_v13, %v526_v16 }
 0x6ef   : > { %v590_v14 = vpop.permute.xlu0 %589 }
 0x6f0   : > { %v592_v15 = vmul.f32 %v1508_v13, %v590_v14 }
 0x6f2   : > { %594 = vrot.lane.b32.xlu1 %v592_v15, %s1579_s5 }
 0x700   : > { %v1760_v22 = vpop.permute.xlu0 %609 }
 0x701   : > { %vm611_vm7 = vcmp.eq.s32.totalorder %v1760_v22, 1 }
 0x764   : > { %v595_v19 = vpop.permute.xlu1 %594 }
 0x765   : > { %v597_v20 = vadd.f32 %v595_v19, %v587_v18 }
 0x767   : > { %1509 = vtanh.f32 %v597_v20  ;;  %v620_v45 = vsel %vm611_vm7, %v597_v20, %v526_v16 }
 0x771   : > { %v1510_v21 = vpop.eup %1509 }
 0x772   : > { %600 = vrot.lane.b32.xlu1 %v1510_v21, %s1578_s30 }
 0x7e4   : > { %v601_v23 = vpop.permute.xlu1 %600 }
 0x7e5   : > { %v1762_v24 = vmul.f32 %v1508_v13, %v601_v23 }
 0x7e7   : > { %v619_v25 = vsel %vm611_vm7, %v1762_v24, %v525_v58  ;;  %v719_v58 = vld [vmem:[%s718_s20] sm:$0xff]  ;;  %s903_s20 = smul.u32 6, %s1710_s11 }
 0x7e8   : > { %v626_v26 = vpack.c.bf16 %v619_v25, %v619_v25 }
 0x7e9   : > { %s1866_s23 = sadd.s32 %s903_s20, %s1680_s6 }
 0x7ea   : > { %628 = vrot.lane.b32.xlu1 %v626_v26, %s1579_s5 }
 0x85c   : > { %v629_v27 = vpop.permute.xlu1 %628 }
 0x85d   : > { %1418 = vmatmul.mubr.msk.bf16.vlgmr.msra.gmra.mrb[4].mxu1 %vm309_vm0, %v629_v27  ;;  %v813_v27 = vld [vmem:[%s812_s8] sm:$0xff]  ;;  %s1996_s8 = sshll.u32 %s1866_s23, 3 }
 0x85e   : > { %1430 = vmatpush3.bf16.msra.mxu1 %v1644_v1  ;;  %1433 = vmatprep.mubr.msk.bf16.mxu1 %vm1576_vm1, %v1575_v0  ;;  %s906_s7 = scalar_lea.vmem %s1670_s28, %s1996_s8 }
 0x85f   : > { %1431 = vmatprep.subr.bf16.mxu1 %v1575_v0 }
 0x862   : > { %1432 = vmatpush3.bf16.msra.mxu1 %v1647_v2 }
 0x863   : > { %1445 = vmatprep.subr.bf16.mxu1 %v1575_v0 }
 0x930   : > { %v667_v30 = vpop.f32.mrb[4].mxu1 }
 0x931   : > { %v673_v32 = vadd.f32 %v667_v30, %v625_v29  ;;  %v1419_v33 = vpop.f32.mrb[5].mxu1 }
 0x932   : > { %v670_v34 = vpop.f32.mrb[6].mxu1 }
 0x933   : > { %1511 = vtanh.f32 %v673_v32  ;;  %v1420_v35 = vpop.f32.mrb[7].mxu1  ;;  %v1346_v39 = vmul.f32 -1.442695, %v673_v32  ;;  %v887_v34 = vstv %s1840_s26 }
 0x934   : > { %vm888_vm12 = vcmp.lt.s32.totalorder %v887_v34, %v1685_v17 }
 0x935   : > { %1513 = vpow2.f32 %v1346_v39 }
 0x93d   : > { %v1512_v37 = vpop.eup %1511 }
 0x93e   : > { %683 = vrot.lane.b32.xlu0 %v1512_v37, %s1578_s30 }
 0x93f   : > { %v1514_v40 = vpop.eup %1513 }
 0x940   : > { %v677_v41 = vadd.f32 1.0, %v1514_v40 }
 0x942   : > { %703 = vperm.xlu0 %1484, %v701_v38   ;;  %1515 = vrcp.f32 %v677_v41 }
 0x94c   : > { %v1516_v42 = vpop.eup %1515 }
 0x94d   : > { %v681_v46 = vmul.f32 %v1516_v42, %v620_v45 }
 0x9b0   : > { %v684_v43 = vpop.permute.xlu0 %683 }
 0x9b1   : > { %v686_v44 = vmul.f32 %v1516_v42, %v684_v43 }
 0x9b3   : > { %688 = vrot.lane.b32.xlu1 %v686_v44, %s1579_s5 }
 0x9c1   : > { %v1792_v50 = vpop.permute.xlu0 %703 }
 0x9c2   : > { %vm705_vm9 = vcmp.eq.s32.totalorder %v1792_v50, 1 }
 0xa25   : > { %v689_v47 = vpop.permute.xlu1 %688 }
 0xa26   : > { %v691_v48 = vadd.f32 %v689_v47, %v681_v46 }
 0xa28   : > { %1517 = vtanh.f32 %v691_v48  ;;  %v714_v13 = vsel %vm705_vm9, %v691_v48, %v620_v45 }
 0xa32   : > { %v1518_v49 = vpop.eup %1517 }
 0xa33   : > { %694 = vrot.lane.b32.xlu1 %v1518_v49, %s1578_s30 }
 0xaa5   : > { %v695_v51 = vpop.permute.xlu1 %694 }
 0xaa6   : > { %v1794_v52 = vmul.f32 %v1516_v42, %v695_v51 }
 0xaa8   : > { %v713_v53 = vsel %vm705_vm9, %v1794_v52, %v619_v25 }
 0xaa9   : > { %v720_v54 = vpack.c.bf16 %v713_v53, %v713_v53 }
 0xaab   : > { %722 = vrot.lane.b32.xlu0 %v720_v54, %s1579_s5  ;;  %v907_v54 = vld [vmem:[%s906_s7] sm:$0xff]  ;;  %s997_s7 = smul.u32 7, %s1710_s11 }
 0xaad   : > { %s1889_s20 = sadd.s32 %s997_s7, %s1680_s6 }
 0xaae   : > { %s1357_s8 = sshll.u32 %s1889_s20, 3  ;;  %v1075_v34 = vstv %s1889_s20 }
 0xaaf   : > { %s1000_s9 = scalar_lea.vmem %s1670_s28, %s1357_s8 }
 0xb1d   : > { %v723_v56 = vpop.permute.xlu0 %722 }
 0xb1e   : > { %1426 = vmatmul.mubr.msk.bf16.vlgmr.msra.gmra.mrb[8].mxu0 %vm309_vm0, %v723_v56 }
 0xb1f   : > { %1438 = vmatpush3.bf16.msra.mxu0 %v1644_v1  ;;  %1441 = vmatprep.mubr.msk.bf16.mxu0 %vm1576_vm1, %v1575_v0 }
 0xb20   : > { %1439 = vmatprep.subr.bf16.mxu0 %v1575_v0 }
 0xb23   : > { %1440 = vmatpush3.bf16.msra.mxu0 %v1647_v2 }
 0xbf1   : > { %v761_v59 = vpop.f32.mrb[8].mxu0 }
 0xbf2   : > { %v767_v60 = vadd.f32 %v761_v59, %v719_v58  ;;  %v1427_v61 = vpop.f32.mrb[9].mxu0 }
 0xbf3   : > { %v764_v62 = vpop.f32.mrb[10].mxu0 }
 0xbf4   : > { %1519 = vtanh.f32 %v767_v60  ;;  %v1428_v63 = vpop.f32.mrb[11].mxu0  ;;  %v1350_v6 = vmul.f32 -1.442695, %v767_v60  ;;  %v981_v62 = vstv %s1866_s23 }
 0xbf5   : > { %vm982_vm14 = vcmp.lt.s32.totalorder %v981_v62, %v1685_v17 }
 0xbf6   : > { %1521 = vpow2.f32 %v1350_v6  ;;  %v983_v3 = vsel %vm982_vm14, 1, %v1577_v11 }
 0xbfe   : > { %v1520_v4 = vpop.eup %1519 }
 0xbff   : > { %777 = vrot.lane.b32.xlu1 %v1520_v4, %s1578_s30 }
 0xc00   : > { %v1522_v7 = vpop.eup %1521 }
 0xc01   : > { %v771_v8 = vadd.f32 1.0, %v1522_v7 }
 0xc03   : > { %797 = vperm.xlu1 %1483, %v795_v5   ;;  %1523 = vrcp.f32 %v771_v8 }
 0xc0d   : > { %v1524_v9 = vpop.eup %1523 }
 0xc0e   : > { %v775_v14 = vmul.f32 %v1524_v9, %v714_v13 }
 0xc71   : > { %v778_v10 = vpop.permute.xlu1 %777 }
 0xc72   : > { %v780_v12 = vmul.f32 %v1524_v9, %v778_v10 }
 0xc74   : > { %782 = vrot.lane.b32.xlu0 %v780_v12, %s1579_s5 }
 0xc82   : > { %v1823_v19 = vpop.permute.xlu1 %797 }
 0xc83   : > { %vm799_vm11 = vcmp.eq.s32.totalorder %v1823_v19, 1 }
 0xce6   : > { %v783_v15 = vpop.permute.xlu0 %782 }
 0xce7   : > { %v785_v16 = vadd.f32 %v783_v15, %v775_v14 }
 0xce9   : > { %1525 = vtanh.f32 %v785_v16  ;;  %v808_v41 = vsel %vm799_vm11, %v785_v16, %v714_v13 }
 0xcf3   : > { %v1526_v18 = vpop.eup %1525 }
 0xcf4   : > { %788 = vrot.lane.b32.xlu0 %v1526_v18, %s1578_s30 }
 0xd66   : > { %v789_v20 = vpop.permute.xlu0 %788 }
 0xd67   : > { %v1825_v21 = vmul.f32 %v1524_v9, %v789_v20 }
 0xd69   : > { %v807_v23 = vsel %vm799_vm11, %v1825_v21, %v713_v53 }
 0xd6a   : > { %v814_v25 = vpack.c.bf16 %v807_v23, %v807_v23 }
 0xd6c   : > { %816 = vrot.lane.b32.xlu1 %v814_v25, %s1579_s5 }
 0xdde   : > { %v817_v26 = vpop.permute.xlu1 %816 }
 0xddf   : > { %1434 = vmatmul.mubr.msk.bf16.vlgmr.msra.gmra.mrb[8].mxu1 %vm309_vm0, %v817_v26 }
 0xde0   : > { %1446 = vmatpush3.bf16.msra.mxu1 %v1644_v1  ;;  %1449 = vmatprep.mubr.msk.bf16.mxu1 %vm1576_vm1, %v1575_v0  ;;  %vm1076_vm1 = vcmp.lt.s32.totalorder %v1075_v34, %v1685_v17  ;;  %v800_v17 = vsel %vm799_vm11, %v1825_v21, 0.0 }
 0xde1   : > { %1447 = vmatprep.subr.bf16.mxu1 %v1575_v0 }
 0xde4   : > { %1448 = vmatpush3.bf16.msra.mxu1 %v1647_v2  ;;  %v889_v2 = vsel %vm888_vm12, 1, %v1577_v11 }
 0xeb2   : > { %v855_v29 = vpop.f32.mrb[8].mxu1 }
 0xeb3   : > { %v861_v30 = vadd.f32 %v855_v29, %v813_v27  ;;  %v1435_v1 = vpop.f32.mrb[9].mxu1  ;;  %v1001_v27 = vld [vmem:[%s1000_s9] sm:$0xff]  ;;  %s1919_s9 = scalar_lea.vmem %s1993_s3, %s1362_s24 }
 0xeb4   : > { %v858_v32 = vpop.f32.mrb[10].mxu1  ;;  %s426_s11 = scalar_lea.vmem %s1919_s9, %s1332_s25  ;;  %s523_s15 = scalar_lea.vmem %s1919_s9, %s1337_s13 }
 0xeb5   : > { %1527 = vtanh.f32 %v861_v30  ;;  %v1436_v33 = vpop.f32.mrb[11].mxu1  ;;  %v1353_v35 = vmul.f32 -1.442695, %v861_v30  ;;  %s617_s24 = scalar_lea.vmem %s1919_s9, %s1341_s22  ;;  %s711_s25 = scalar_lea.vmem %s1919_s9, %s1344_s29 }
 0xeb6   : > { %s1999_s13 = sshll.u32 %s1840_s26, 3  ;;  %s1087_s27 = scalar_lea.vmem %s1919_s9, %s1357_s8 }
 0xeb7   : > { %1529 = vpow2.f32 %v1353_v35  ;;  %v421_v35 = vsel %vm420_vm3, %v1695_v31, 0.0  ;;  %s899_s21 = scalar_lea.vmem %s1919_s9, %s1999_s13  ;;  %s1330_s29 = sshll.u32 %s1635_s19, 3 }
 0xeb8   : > { %s303_s26 = scalar_lea.vmem %s1994_s4, %s1330_s29 }
 0xebf   : > { %v1528_v0 = vpop.eup %1527 }
 0xec0   : > { %871 = vrot.lane.b32.xlu0 %v1528_v0, %s1578_s30 }
 0xec1   : > { %v1530_v36 = vpop.eup %1529 }
 0xec2   : > { %v865_v37 = vadd.f32 1.0, %v1530_v36  ;;  %v612_v36 = vsel %vm611_vm7, %v1762_v24, 0.0 }
 0xec4   : > { %891 = vperm.xlu0 %1484, %v889_v2   ;;  %1531 = vrcp.f32 %v865_v37  ;;  %v1077_v2 = vsel %vm1076_vm1, 1, %v1577_v11 }
 0xece   : > { %v1532_v38 = vpop.eup %1531 }
 0xecf   : > { %v869_v42 = vmul.f32 %v1532_v38, %v808_v41 }
 0xf32   : > { %v872_v39 = vpop.permute.xlu0 %871 }
 0xf33   : > { %v874_v40 = vmul.f32 %v1532_v38, %v872_v39 }
 0xf35   : > { %876 = vrot.lane.b32.xlu1 %v874_v40, %s1579_s5 }
 0xf43   : > { %v1854_v46 = vpop.permute.xlu0 %891 }
 0xf44   : > { %vm893_vm13 = vcmp.eq.s32.totalorder %v1854_v46, 1 }
 0xfa7   : > { %v877_v43 = vpop.permute.xlu1 %876 }
 0xfa8   : > { %v879_v44 = vadd.f32 %v877_v43, %v869_v42 }
 0xfaa   : > { %1533 = vtanh.f32 %v879_v44  ;;  %v902_v10 = vsel %vm893_vm13, %v879_v44, %v808_v41 }
 0xfb4   : > { %v1534_v45 = vpop.eup %1533 }
 0xfb5   : > { %882 = vrot.lane.b32.xlu1 %v1534_v45, %s1578_s30  ;;  %v518_v45 = vsel %vm517_vm5, %v1730_v57, 0.0 }
0x1027   : > { %v883_v47 = vpop.permute.xlu1 %882 }
0x1028   : > { %v1856_v48 = vmul.f32 %v1532_v38, %v883_v47  ;;  %v706_v47 = vsel %vm705_vm9, %v1794_v52, 0.0 }
0x102a   : > { %v901_v49 = vsel %vm893_vm13, %v1856_v48, %v807_v23 }
0x102b   : > { %v908_v51 = vpack.c.bf16 %v901_v49, %v901_v49 }
0x102d   : > { %910 = vrot.lane.b32.xlu0 %v908_v51, %s1579_s5 }
0x109f   : > { %v911_v53 = vpop.permute.xlu0 %910 }
0x10a0   : > { %1442 = vmatmul.mubr.msk.bf16.vlgmr.msra.gmra.mrb[12].mxu0 %vm309_vm0, %v911_v53 }
0x1173   : > { %v949_v56 = vpop.f32.mrb[12].mxu0 }
0x1174   : > { %v955_v58 = vadd.f32 %v949_v56, %v907_v54  ;;  %v1443_v59 = vpop.f32.mrb[13].mxu0 }
0x1175   : > { %v952_v60 = vpop.f32.mrb[14].mxu0 }
0x1176   : > { %1535 = vtanh.f32 %v955_v58  ;;  %v1444_v61 = vpop.f32.mrb[15].mxu0  ;;  %v1356_v4 = vmul.f32 -1.442695, %v955_v58 }
0x1178   : > { %1537 = vpow2.f32 %v1356_v4 }
0x1180   : > { %v1536_v63 = vpop.eup %1535 }
0x1181   : > { %965 = vrot.lane.b32.xlu1 %v1536_v63, %s1578_s30 }
0x1182   : > { %v1538_v5 = vpop.eup %1537 }
0x1183   : > { %v959_v6 = vadd.f32 1.0, %v1538_v5 }
0x1185   : > { %985 = vperm.xlu1 %1483, %v983_v3   ;;  %1539 = vrcp.f32 %v959_v6 }
0x118f   : > { %v1540_v7 = vpop.eup %1539 }
0x1190   : > { %v963_v12 = vmul.f32 %v1540_v7, %v902_v10 }
0x11f3   : > { %v966_v8 = vpop.permute.xlu1 %965 }
0x11f4   : > { %v968_v9 = vmul.f32 %v1540_v7, %v966_v8 }
0x11f6   : > { %970 = vrot.lane.b32.xlu0 %v968_v9, %s1579_s5 }
0x1204   : > { %v986_v16 = vpop.permute.xlu1 %985 }
0x1205   : > { %vm987_vm15 = vcmp.eq.s32.totalorder %v986_v16, 1 }
0x1268   : > { %v971_v13 = vpop.permute.xlu0 %970 }
0x1269   : > { %v973_v14 = vadd.f32 %v971_v13, %v963_v12 }
0x126b   : > { %1541 = vtanh.f32 %v973_v14  ;;  %v996_v39 = vsel %vm987_vm15, %v973_v14, %v902_v10 }
0x1275   : > { %v1542_v15 = vpop.eup %1541 }
0x1276   : > { %976 = vrot.lane.b32.xlu0 %v1542_v15, %s1578_s30 }
0x12e8   : > { %v977_v18 = vpop.permute.xlu0 %976 }
0x12e9   : > { %v979_v20 = vmul.f32 %v1540_v7, %v977_v18 }
0x12eb   : > { %v1881_v23 = vsel %vm987_vm15, %v979_v20, %v901_v49  ;;  %v988_v11 = vsel %vm987_vm15, %v979_v20, 0.0  ;;  %v894_v49 = vsel %vm893_vm13, %v1856_v48, 0.0 }
0x12ec   : > { %v1002_v25 = vpack.c.bf16 %v1881_v23, %v1881_v23 }
0x12ee   : > { %1004 = vrot.lane.b32.xlu1 %v1002_v25, %s1579_s5 }
0x1360   : > { %v1005_v26 = vpop.permute.xlu1 %1004 }
0x1361   : > { %1450 = vmatmul.mubr.msk.bf16.vlgmr.msra.gmra.mrb[12].mxu1 %vm309_vm0, %v1005_v26 }
0x1434   : > { %v1043_v29 = vpop.f32.mrb[12].mxu1 }
0x1435   : > { %v1049_v30 = vadd.f32 %v1043_v29, %v1001_v27  ;;  %v1451_v1 = vpop.f32.mrb[13].mxu1 }
0x1436   : > { %v1046_v32 = vpop.f32.mrb[14].mxu1 }
0x1437   : > { %1543 = vtanh.f32 %v1049_v30  ;;  %v1452_v33 = vpop.f32.mrb[15].mxu1  ;;  %v1359_v28 = vmul.f32 -1.442695, %v1049_v30 }
0x1439   : > { %1545 = vpow2.f32 %v1359_v28 }
0x1441   : > { %v1544_v0 = vpop.eup %1543 }
0x1442   : > { %1059 = vrot.lane.b32.xlu0 %v1544_v0, %s1578_s30 }
0x1443   : > { %v1546_v31 = vpop.eup %1545 }
0x1444   : > { %v1053_v37 = vadd.f32 1.0, %v1546_v31 }
0x1446   : > { %1079 = vperm.xlu0 %1484, %v1077_v2   ;;  %1547 = vrcp.f32 %v1053_v37 }
0x144a   : > { %423 = vrot.lane.b32.xlu0 %v421_v35, %s1579_s5 }
0x144e   : > { %614 = vrot.lane.b32.xlu0 %v612_v36, %s1579_s5 }
0x1450   : > { %v1548_v22 = vpop.eup %1547 }
0x1451   : > { %v1057_v40 = vmul.f32 %v1548_v22, %v996_v39 }
0x1452   : > { %802 = vrot.lane.b32.xlu0 %v800_v17, %s1579_s5 }
0x1456   : > { %990 = vrot.lane.b32.xlu0 %v988_v11, %s1579_s5 }
0x14b4   : > { %v1060_v24 = vpop.permute.xlu0 %1059 }
0x14b5   : > { %v1062_v38 = vmul.f32 %v1548_v22, %v1060_v24 }
0x14b7   : > { %1064 = vrot.lane.b32.xlu1 %v1062_v38, %s1579_s5 }
0x14c5   : > { %v1080_v19 = vpop.permute.xlu0 %1079 }
0x14c6   : > { %vm1081_vm2 = vcmp.eq.s32.totalorder %v1080_v19, 1 }
0x14c9   : > { %v424_v21 = vpop.permute.xlu0 %423 }
0x14ca   : > { %427 = vst.msk [vmem:[%s426_s11] sm:$0xff] %vm309_vm0, %v424_v21 }
0x14cd   : > { %v615_v57 = vpop.permute.xlu0 %614 }
0x14d1   : > { %v803_v48 = vpop.permute.xlu0 %802 }
0x14d5   : > { %v991_v56 = vpop.permute.xlu0 %990 }
0x1529   : > { %v1065_v41 = vpop.permute.xlu1 %1064 }
0x152a   : > { %v1067_v42 = vadd.f32 %v1065_v41, %v1057_v40 }
0x152c   : > { %1549 = vtanh.f32 %v1067_v42  ;;  %v1090_v43 = vsel %vm1081_vm2, %v1067_v42, %v996_v39 }
0x1536   : > { %v1550_v44 = vpop.eup %1549 }
0x1537   : > { %1070 = vrot.lane.b32.xlu1 %v1550_v44, %s1578_s30  ;;  %s805_s30 = scalar_lea.vmem %s1919_s9, %s1348_s14 }
0x153b   : > { %520 = vrot.lane.b32.xlu1 %v518_v45, %s1579_s5 }
0x153f   : > { %708 = vrot.lane.b32.xlu1 %v706_v47, %s1579_s5 }
0x1543   : > { %896 = vrot.lane.b32.xlu1 %v894_v49, %s1579_s5 }
0x15a9   : > { %v1071_v55 = vpop.permute.xlu1 %1070 }
0x15aa   : > { %v1073_v51 = vmul.f32 %v1548_v22, %v1071_v55 }
0x15ac   : > { %v1082_v50 = vsel %vm1081_vm2, %v1073_v51, 0.0  ;;  %v1089_v52 = vsel %vm1081_vm2, %v1073_v51, %v1881_v23 }
0x15ad   : > { %1084 = vrot.lane.b32.xlu1 %v1082_v50, %s1579_s5  ;;  %v521_v46 = vpop.permute.xlu1 %520  ;;  %1092 = vrot.lane.b32.xlu0 %v1089_v52, %s1579_s5  ;;  %s2000_s5 = sshll.u32 %s1866_s23, 3 }
0x15ae   : > { %524 = vst.msk [vmem:[%s523_s15] sm:$0xff] %vm309_vm0, %v521_v46  ;;  %s993_s22 = scalar_lea.vmem %s1919_s9, %s2000_s5 }
0x15af   : > { %618 = vst.msk [vmem:[%s617_s24] sm:$0xff] %vm309_vm0, %v615_v57 }
0x15b1   : > { %1097 = vrot.lane.b32.xlu1 %v1090_v43, %s1998_s12  ;;  %v709_v53 = vpop.permute.xlu1 %708 }
0x15b2   : > { %712 = vst.msk [vmem:[%s711_s25] sm:$0xff] %vm309_vm0, %v709_v53 }
0x15b3   : > { %806 = vst.msk [vmem:[%s805_s30] sm:$0xff] %vm309_vm0, %v803_v48 }
0x15b5   : > { %v897_v54 = vpop.permute.xlu1 %896 }
0x15b6   : > { %900 = vst.msk [vmem:[%s899_s21] sm:$0xff] %vm309_vm0, %v897_v54 }
0x15b7   : > { %994 = vst.msk [vmem:[%s993_s22] sm:$0xff] %vm309_vm0, %v991_v56 }
0x161f   : > { %v1085_v58 = vpop.permute.xlu1 %1084  ;;  %v1093_v59 = vpop.permute.xlu0 %1092 }
0x1620   : > { %1088 = vst.msk [vmem:[%s1087_s27] sm:$0xff] %vm309_vm0, %v1085_v58  ;;  %1095 = vst.msk [vmem:[#allocation2] sm:$0xff] %vm309_vm0, %v1093_v59 }
0x1623   : > { %v1098_v60 = vpop.permute.xlu1 %1097 }
0x1624   : > { %1100 = vst.msk [vmem:[#allocation3] sm:$0xff] %vm309_vm0, %v1098_v60  ;;  %1101 = vst.msk [vmem:[%s303_s26] sm:$0xff] %vm309_vm0, %v1098_v60 }
0x1625 PF: > { %s15_s17 = sadd.s32 1, %s1573_s17   ;;  %s2001_s15 = smov %s1569_s16 }
0x1626   : > { %p12_p5 = scmp.ge.s32.totalorder %s15_s17, 4   ;;  %s2002_s16 = smov %s2004_s18 }
0x1628   :  { %14 = sbr.rel (!%p12_p5) target bundleno = 2 (0x2), region = 97 }

// kernel: encoder_forward.10
= control target key start
LH: loop header
LB: loop body
LE: loop exit
PB: predicated region body
PF: predicated region fallthrough
CT: control target
= control target key end

     0   :  { %vm83_vm0 = vcmask 261120   ;;  %s508_s1 = inlined_call_operand.vmem [shape: bf16[32,32], index: 1, kind: input, shape index: {}]   ;;  %s509_s2 = inlined_call_operand.vmem [shape: bf16[32,32], index: 2, kind: input, shape index: {}]   ;;  %s510_s0 = inlined_call_operand.vmem [shape: f32[2,64,32], index: 0, kind: input, shape index: {}]   ;;  %s511_s3 = inlined_call_operand.vmem [shape: f32[1,32], index: 3, kind: input, shape index: {}]   ;;  %s512_s4 = inlined_call_operand.vmem [shape: f32[1,32], index: 4, kind: input, shape index: {}]   ;;  %s513_s5 = inlined_call_operand.vmem [shape: f32[64,32], index: 5, kind: output, shape index: {0}]   ;;  %s514_s6 = inlined_call_operand.vmem [shape: f32[64,32], index: 6, kind: output, shape index: {1}]  }
   0x1   :  { %v331_v0 = vld [vmem:[%s508_s1] sm:$0xff]   ;;  %v333_v2 = vld [vmem:[%s508_s1 + $0x8] sm:$0xff]   ;;  %v25_v9 = vld [vmem:[%s510_s0 + $0x10] sm:$0xff] }
   0x2   :  { %v332_v1 = vld [vmem:[%s509_s2] sm:$0xff]   ;;  %307 = vmatprep.subr.bf16.mxu0 %v331_v0  ;;  %v334_v3 = vld [vmem:[%s509_s2 + $0x8] sm:$0xff]   ;;  %v26_v10 = vld [vmem:[%s510_s0 + $0x18] sm:$0xff] }
   0x3   :  { %319 = vmatprep.subr.bf16.mxu1 %v332_v1  ;;  %308 = vmatpush3.bf16.msra.mxu0 %v331_v0  ;;  %v23_v4 = vld [vmem:[%s510_s0] sm:$0xff]  ;;  %v24_v5 = vld [vmem:[%s510_s0 + $0x8] sm:$0xff]  ;;  %v275_v12 = vld [vmem:[%s510_s0 + $0x50] sm:$0xff] }
   0x4   :  { %320 = vmatpush3.bf16.msra.mxu1 %v332_v1  ;;  %309 = vmatprep.subr.bf16.mxu0 %v333_v2  ;;  %v273_v6 = vld [vmem:[%s510_s0 + $0x40] sm:$0xff]  ;;  %v274_v7 = vld [vmem:[%s510_s0 + $0x48] sm:$0xff]  ;;  %v276_v13 = vld [vmem:[%s510_s0 + $0x58] sm:$0xff]  ;;  %v42_v16 = vadd.f32 %v275_v12, %v25_v9 }
   0x5   :  { %321 = vmatprep.subr.bf16.mxu1 %v334_v3  ;;  %v40_v8 = vadd.f32 %v273_v6, %v23_v4  ;;  %v41_v11 = vadd.f32 %v274_v7, %v24_v5  ;;  %v27_v14 = vld [vmem:[%s510_s0 + $0x20] sm:$0xff]  ;;  %v43_v17 = vadd.f32 %v276_v13, %v26_v10  ;;  %v28_v18 = vld [vmem:[%s510_s0 + $0x28] sm:$0xff]  ;;  %v29_v24 = vld [vmem:[%s510_s0 + $0x30] sm:$0xff] }
   0x6   :  { %v277_v19 = vld [vmem:[%s510_s0 + $0x60] sm:$0xff]  ;;  %v278_v20 = vld [vmem:[%s510_s0 + $0x68] sm:$0xff]  ;;  %v30_v25 = vld [vmem:[%s510_s0 + $0x38] sm:$0xff]  ;;  %v50_v27 = vmul.f32 0.5, %v42_v16 }
   0x7   :  { %310 = vmatpush3.bf16.msra.mxu0 %v333_v2  ;;  %v48_v15 = vmul.f32 0.5, %v40_v8  ;;  %v49_v21 = vmul.f32 0.5, %v41_v11  ;;  %v44_v22 = vadd.f32 %v277_v19, %v27_v14  ;;  %v45_v23 = vadd.f32 %v278_v20, %v28_v18  ;;  %v279_v26 = vld [vmem:[%s510_s0 + $0x70] sm:$0xff]  ;;  %v280_v29 = vld [vmem:[%s510_s0 + $0x78] sm:$0xff]  ;;  %v281_v40 = vld [vmem:[%s511_s3] ss:$0 sm:$0xff] }
   0x8   :  { %322 = vmatpush3.bf16.msra.mxu1 %v334_v3  ;;  %v51_v28 = vmul.f32 0.5, %v43_v17  ;;  %v46_v30 = vadd.f32 %v279_v26, %v29_v24  ;;  %v47_v34 = vadd.f32 %v280_v29, %v30_v25  ;;  %v288_v41 = vld [vmem:[%s512_s4] ss:$0 sm:$0xff] }
   0x9   :  { %v56_v31 = vpack.c.bf16 %v49_v21, %v48_v15  ;;  %v52_v32 = vmul.f32 0.5, %v44_v22  ;;  %v53_v33 = vmul.f32 0.5, %v45_v23 }
   0xa   :  { %v57_v35 = vpack.c.bf16 %v51_v28, %v50_v27  ;;  %v54_v37 = vmul.f32 0.5, %v46_v30  ;;  %v55_v38 = vmul.f32 0.5, %v47_v34 }
   0xb   :  { %311 = vmatprep.mubr.msk.bf16.mxu0 %vm83_vm0, %v56_v31  ;;  %323 = vmatprep.mubr.msk.bf16.mxu1 %vm83_vm0, %v56_v31  ;;  %v58_v36 = vpack.c.bf16 %v53_v33, %v52_v32 }
   0xc   :  { %312 = vmatmul.mubr.msk.bf16.vlgmr.msra.gmra.mrb[0].mxu0 %vm83_vm0, %v57_v35  ;;  %324 = vmatmul.mubr.msk.bf16.vlgmr.msra.gmra.mrb[0].mxu1 %vm83_vm0, %v57_v35  ;;  %v59_v39 = vpack.c.bf16 %v55_v38, %v54_v37 }
   0xd   :  { %315 = vmatprep.mubr.msk.bf16.mxu0 %vm83_vm0, %v58_v36  ;;  %327 = vmatprep.mubr.msk.bf16.mxu1 %vm83_vm0, %v58_v36 }
  0x14   :  { %316 = vmatmul.mubr.msk.bf16.gmra.mrb[4].mxu0 %vm83_vm0, %v59_v39  ;;  %328 = vmatmul.mubr.msk.bf16.gmra.mrb[4].mxu1 %vm83_vm0, %v59_v39 }
  0xdf   :  { %v313_v42 = vpop.f32.mrb[0].mxu0  ;;  %v325_v43 = vpop.f32.mrb[0].mxu1 }
  0xe0   :  { %v139_v44 = vadd.f32 %v313_v42, %v281_v40  ;;  %v235_v45 = vadd.f32 %v325_v43, %v288_v41  ;;  %v130_v46 = vpop.f32.mrb[1].mxu0  ;;  %v226_v47 = vpop.f32.mrb[1].mxu1 }
  0xe1   :  { %v131_v48 = vadd.f32 %v281_v40, %v130_v46  ;;  %v227_v49 = vadd.f32 %v288_v41, %v226_v47  ;;  %v314_v50 = vpop.f32.mrb[2].mxu0  ;;  %v326_v51 = vpop.f32.mrb[2].mxu1 }
  0xe2   :  { %163 = vst.msk [vmem:[%s513_s5 + $0x10] sm:$0xff] %vm83_vm0, %v139_v44  ;;  %259 = vst.msk [vmem:[%s514_s6 + $0x10] sm:$0xff] %vm83_vm0, %v235_v45  ;;  %v142_v52 = vadd.f32 %v314_v50, %v281_v40  ;;  %v238_v53 = vadd.f32 %v326_v51, %v288_v41  ;;  %v133_v54 = vpop.f32.mrb[3].mxu0  ;;  %v229_v55 = vpop.f32.mrb[3].mxu1 }
  0xe3   :  { %161 = vst.msk [vmem:[%s513_s5] sm:$0xff] %vm83_vm0, %v131_v48  ;;  %257 = vst.msk [vmem:[%s514_s6] sm:$0xff] %vm83_vm0, %v227_v49  ;;  %v134_v56 = vadd.f32 %v281_v40, %v133_v54  ;;  %v230_v57 = vadd.f32 %v288_v41, %v229_v55 }
  0xe4   :  { %164 = vst.msk [vmem:[%s513_s5 + $0x18] sm:$0xff] %vm83_vm0, %v142_v52  ;;  %260 = vst.msk [vmem:[%s514_s6 + $0x18] sm:$0xff] %vm83_vm0, %v238_v53 }
  0xe5   :  { %162 = vst.msk [vmem:[%s513_s5 + $0x8] sm:$0xff] %vm83_vm0, %v134_v56  ;;  %258 = vst.msk [vmem:[%s514_s6 + $0x8] sm:$0xff] %vm83_vm0, %v230_v57 }
  0xe7   :  { %v317_v58 = vpop.f32.mrb[4].mxu0  ;;  %v329_v59 = vpop.f32.mrb[4].mxu1 }
  0xe8   :  { %v155_v60 = vadd.f32 %v317_v58, %v281_v40  ;;  %v251_v61 = vadd.f32 %v329_v59, %v288_v41  ;;  %v146_v62 = vpop.f32.mrb[5].mxu0  ;;  %v242_v63 = vpop.f32.mrb[5].mxu1 }
  0xe9   :  { %v147_v0 = vadd.f32 %v281_v40, %v146_v62  ;;  %v243_v1 = vadd.f32 %v288_v41, %v242_v63  ;;  %v318_v2 = vpop.f32.mrb[6].mxu0  ;;  %v330_v3 = vpop.f32.mrb[6].mxu1 }
  0xea   :  { %167 = vst.msk [vmem:[%s513_s5 + $0x30] sm:$0xff] %vm83_vm0, %v155_v60  ;;  %263 = vst.msk [vmem:[%s514_s6 + $0x30] sm:$0xff] %vm83_vm0, %v251_v61  ;;  %v158_v4 = vadd.f32 %v318_v2, %v281_v40  ;;  %v254_v5 = vadd.f32 %v330_v3, %v288_v41  ;;  %v149_v6 = vpop.f32.mrb[7].mxu0  ;;  %v245_v7 = vpop.f32.mrb[7].mxu1 }
  0xeb   :  { %165 = vst.msk [vmem:[%s513_s5 + $0x20] sm:$0xff] %vm83_vm0, %v147_v0  ;;  %261 = vst.msk [vmem:[%s514_s6 + $0x20] sm:$0xff] %vm83_vm0, %v243_v1  ;;  %v150_v8 = vadd.f32 %v281_v40, %v149_v6  ;;  %v246_v9 = vadd.f32 %v288_v41, %v245_v7 }
  0xec   :  { %168 = vst.msk [vmem:[%s513_s5 + $0x38] sm:$0xff] %vm83_vm0, %v158_v4  ;;  %264 = vst.msk [vmem:[%s514_s6 + $0x38] sm:$0xff] %vm83_vm0, %v254_v5 }
  0xed   :  { %166 = vst.msk [vmem:[%s513_s5 + $0x28] sm:$0xff] %vm83_vm0, %v150_v8  ;;  %262 = vst.msk [vmem:[%s514_s6 + $0x28] sm:$0xff] %vm83_vm0, %v246_v9 }

</bundles_post_ra>
